<compile_context>
chip_gen: v7x
topology: tpu7x:2x2x1
jax: 0.10.0
libtpu: 0.0.40
codegen_flags: <defaults>
</compile_context>

<pallas_src>
import functools
import math

import jax
import jax.numpy as jnp
from jax.experimental import pallas as pl
from jax.experimental.pallas import tpu as pltpu

CP = 128                              # lane-padded channel / hidden width
VMEM_LIMIT = 32 * 1024 * 1024         # explicit scoped-VMEM budget (headroom on all gens)


def _round8(n):
    return ((n + 7) // 8) * 8


NP_PAD1 = _round8(14 * 14)   # 200: pooled 28x28 -> 14x14, 8-aligned rows
NP_PAD2 = _round8(5 * 5)     # 32:  pooled 10x10 -> 5x5,  8-aligned rows


# ---------------------------------------------------------------------------
# Pallas kernels
# ---------------------------------------------------------------------------

def _conv_pool_kernel(col_ref, w_ref, b_ref, o_ref, *, np_pad, bt):
    """Fused (patches @ W) -> 2x2 maxpool -> +bias -> ReLU for one batch tile.

    col_ref: (Bt, 4*np_pad, K) bf16   corner-blocked patch rows
    w_ref:   (K, 128)          bf16   lane-padded conv weights
    b_ref:   (1, 128)          f32    lane-padded bias (padding is zero)
    o_ref:   (Bt, np_pad, 128) bf16   pooled NHWC rows (hw-major), lane-dense
    """
    m4 = 4 * np_pad
    k = col_ref.shape[-1]
    # Merge the batch tile into the row dim: one big MXU matmul per grid step
    # (leading-dim merge is layout-free: 4*np_pad is sublane-tile aligned).
    col = col_ref[...].reshape(bt * m4, k)
    res = jnp.dot(col, w_ref[...], preferred_element_type=jnp.float32)
    res = res.reshape(bt, m4, CP)
    # 2x2 max-pool on the raw matmul result: the 4 taps of every pooling
    # window are the 4 contiguous, sublane-aligned row blocks.
    pooled = jnp.maximum(
        jnp.maximum(res[:, 0 * np_pad:1 * np_pad], res[:, 1 * np_pad:2 * np_pad]),
        jnp.maximum(res[:, 2 * np_pad:3 * np_pad], res[:, 3 * np_pad:4 * np_pad]))
    # Bias + ReLU after pooling (bit-exact reorder: identical bias on all 4
    # taps, FP add and ReLU are monotone) -- epilogue touches np_pad rows only.
    o_ref[...] = jnp.maximum(pooled + b_ref[...], 0.0).astype(o_ref.dtype)


def _fc_head_kernel(x_ref, w1_ref, b1_ref, w2_ref, b2_ref, w3_ref, b3_ref, o_ref):
    """Fused 3-layer FC head: (x@W1+b1)->ReLU->(W2+b2)->ReLU->(W3+b3).
    Dropouts are identity in eval mode. x/W1 bf16, rest f32, f32 accumulation."""
    h = jnp.dot(x_ref[...], w1_ref[...], preferred_element_type=jnp.float32)
    h = jnp.maximum(h + b1_ref[...], 0.0)
    h = jnp.dot(h, w2_ref[...], preferred_element_type=jnp.float32)
    h = jnp.maximum(h + b2_ref[...], 0.0)
    o = jnp.dot(h, w3_ref[...], preferred_element_type=jnp.float32) + b3_ref[...]
    o_ref[...] = o.astype(o_ref.dtype)


# ---------------------------------------------------------------------------
# pallas_call wrappers
# ---------------------------------------------------------------------------

def conv_pool_stage(col, w_mat, b_vec, np_pad, bt):
    """col: (B, 4*np_pad, K) bf16 (B % bt == 0) -> pooled rows (B, np_pad, 128) bf16."""
    B, M4, K = col.shape
    Cp = w_mat.shape[1]
    flops = 2 * B * M4 * K * Cp
    bytes_acc = 2 * (B * M4 * K + K * Cp + B * np_pad * Cp) + 4 * Cp
    return pl.pallas_call(
        functools.partial(_conv_pool_kernel, np_pad=np_pad, bt=bt),
        out_shape=jax.ShapeDtypeStruct((B, np_pad, Cp), jnp.bfloat16),
        grid=(B // bt,),
        in_specs=[
            pl.BlockSpec((bt, M4, K), lambda i: (i, 0, 0)),
            pl.BlockSpec((K, Cp), lambda i: (0, 0)),
            pl.BlockSpec((1, Cp), lambda i: (0, 0)),
        ],
        out_specs=pl.BlockSpec((bt, np_pad, Cp), lambda i: (i, 0, 0)),
        compiler_params=pltpu.CompilerParams(
            dimension_semantics=("parallel",),
            vmem_limit_bytes=VMEM_LIMIT),
        cost_estimate=pl.CostEstimate(
            flops=int(flops), transcendentals=0, bytes_accessed=int(bytes_acc)),
    )(col, w_mat, b_vec)


def fc_head(x, w1, b1, w2, b2, w3, b3, tb):
    """Batch-tiled FC head. x: (B, 32*128) bf16 (B % tb == 0) -> padded logits (B, 128) f32."""
    B, K1 = x.shape
    H1 = w1.shape[1]
    H2 = w2.shape[1]
    NCp = w3.shape[1]
    flops = 2 * B * (K1 * H1 + H1 * H2 + H2 * NCp)
    bytes_acc = (2 * (B * K1 + K1 * H1)
                 + 4 * (H1 * H2 + H2 * NCp + H1 + H2 + NCp + B * NCp))
    return pl.pallas_call(
        _fc_head_kernel,
        out_shape=jax.ShapeDtypeStruct((B, NCp), jnp.float32),
        grid=(B // tb,),
        in_specs=[
            pl.BlockSpec((tb, K1), lambda i: (i, 0)),
            pl.BlockSpec((K1, H1), lambda i: (0, 0)),
            pl.BlockSpec((1, H1), lambda i: (0, 0)),
            pl.BlockSpec((H1, H2), lambda i: (0, 0)),
            pl.BlockSpec((1, H2), lambda i: (0, 0)),
            pl.BlockSpec((H2, NCp), lambda i: (0, 0)),
            pl.BlockSpec((1, NCp), lambda i: (0, 0)),
        ],
        out_specs=pl.BlockSpec((tb, NCp), lambda i: (i, 0)),
        compiler_params=pltpu.CompilerParams(
            dimension_semantics=("parallel",),
            vmem_limit_bytes=VMEM_LIMIT),
        cost_estimate=pl.CostEstimate(
            flops=int(flops), transcendentals=0, bytes_accessed=int(bytes_acc)),
    )(x, w1, b1, w2, b2, w3, b3)


# ---------------------------------------------------------------------------
# Batch tiling helpers
# ---------------------------------------------------------------------------

def _pick_conv_batch_tile(B):
    """Amortize the ~0.35 us/step pipeline overhead while staying within
    v5e's 16 MiB scoped-VMEM default (cap 8) and keeping >= 2 grid steps so
    both v7x TensorCores get work."""
    if B <= 1:
        return 1
    return max(1, min(8, B // 2))


def _pick_fc_batch_tile(B):
    """Single block for small B (block dim == full array dim); otherwise
    8-aligned tiles so the activation DMA pipelines and both cores help."""
    return B if B <= 64 else 64


def _pad_batch(a, bt):
    pad = (-a.shape[0]) % bt
    if pad:
        a = jnp.pad(a, ((0, pad),) + ((0, 0),) * (a.ndim - 1))
    return a


# ---------------------------------------------------------------------------
# XLA glue: corner-blocked im2col (patch extraction only)
# ---------------------------------------------------------------------------

def _im2col_pooled(x_nhwc, kh, kw, pad, np_pad):
    """Extract conv patches ordered corner-blocked for 2x2 pooling.

    Returns (col, PH, PW) with col: (B, 4*np_pad, kh*kw*C) bf16.
    Row block [k*np_pad : (k+1)*np_pad) holds the patches of pooling-window
    tap k, each in (ph, pw) row-major order (zero-padded to np_pad rows).
    """
    B, H, W, C = x_nhwc.shape
    xp = jnp.pad(x_nhwc, ((0, 0), (pad, pad), (pad, pad), (0, 0)))
    OH = H + 2 * pad - kh + 1
    OW = W + 2 * pad - kw + 1
    patches = [xp[:, i:i + OH, j:j + OW, :] for i in range(kh) for j in range(kw)]
    col = jnp.stack(patches, axis=3)                 # (B, OH, OW, kh*kw, C)
    col = col.reshape(B, OH, OW, kh * kw * C)        # K index = (ki*kw+kj)*C + ci
    PH, PW = OH // 2, OW // 2
    NP = PH * PW
    blocks = []
    for dy in range(2):
        for dx in range(2):
            c = col[:, dy::2, dx::2, :].reshape(B, NP, kh * kw * C)
            if np_pad > NP:
                c = jnp.pad(c, ((0, 0), (0, np_pad - NP), (0, 0)))
            blocks.append(c)
    return jnp.concatenate(blocks, axis=1).astype(jnp.bfloat16), PH, PW


# ---------------------------------------------------------------------------
# Parameters: PyTorch-style init + one-time packing into kernel layouts
# ---------------------------------------------------------------------------

def init_params(key, num_classes):
    """PyTorch-style uniform(-1/sqrt(fan_in), 1/sqrt(fan_in)) init."""
    def uni(k, shape, fan_in):
        bound = 1.0 / math.sqrt(fan_in)
        return jax.random.uniform(k, shape, jnp.float32, -bound, bound)

    ks = jax.random.split(key, 10)
    return {
        "conv1_w": uni(ks[0], (6, 1, 9, 9), 1 * 9 * 9),
        "conv1_b": uni(ks[1], (6,), 1 * 9 * 9),
        "conv2_w": uni(ks[2], (16, 6, 9, 9), 6 * 9 * 9),
        "conv2_b": uni(ks[3], (16,), 6 * 9 * 9),
        "lin1a_w": uni(ks[4], (120, 400), 400),   # PyTorch Linear: (out, in)
        "lin1a_b": uni(ks[5], (120,), 400),
        "lin1b_w": uni(ks[6], (84, 120), 120),
        "lin1b_b": uni(ks[7], (84,), 120),
        "lin2_w": uni(ks[8], (num_classes, 84), 84),
        "lin2_b": uni(ks[9], (num_classes,), 84),
    }


def pack_params(p, num_classes, np_pad2):
    """One-time reshuffle of PyTorch-layout params into kernel layouts:
    (K, 128) bf16 conv weight matrices, (in, out) FC weights (fc1 bf16),
    everything zero-padded to 128 lanes, and fc1's input rows permuted so the
    kernel's pooled (hw, channel-padded) activations are consumed with no
    runtime transpose (reproduces PyTorch's NCHW flatten order exactly)."""
    # conv1: (6,1,9,9) -> (81, 128) bf16
    w1c = jnp.transpose(p["conv1_w"], (2, 3, 1, 0)).reshape(9 * 9 * 1, 6)
    w1c = jnp.pad(w1c, ((0, 0), (0, CP - 6))).astype(jnp.bfloat16)
    b1c = jnp.pad(p["conv1_b"], (0, CP - 6)).reshape(1, CP)
    # conv2: (16,6,9,9) -> (486, 128) bf16
    w2c = jnp.transpose(p["conv2_w"], (2, 3, 1, 0)).reshape(9 * 9 * 6, 16)
    w2c = jnp.pad(w2c, ((0, 0), (0, CP - 16))).astype(jnp.bfloat16)
    b2c = jnp.pad(p["conv2_b"], (0, CP - 16)).reshape(1, CP)

    # FC1: PyTorch input index = c*25 + (h*5+w); kernel activation index =
    # hw*128 + c (hw in [0, np_pad2), c in [0, 128)); unused rows stay zero.
    w_fc1 = p["lin1a_w"].T                          # (400, 120)
    src = jnp.arange(400)
    dst = (src % 25) * CP + (src // 25)
    w1f = (jnp.zeros((np_pad2 * CP, CP), jnp.float32)
           .at[dst, :120].set(w_fc1).astype(jnp.bfloat16))
    b1f = jnp.pad(p["lin1a_b"], (0, CP - 120)).reshape(1, CP)

    w2f = jnp.zeros((CP, CP), jnp.float32).at[:120, :84].set(p["lin1b_w"].T)
    b2f = jnp.pad(p["lin1b_b"], (0, CP - 84)).reshape(1, CP)

    w3f = jnp.zeros((CP, CP), jnp.float32).at[:84, :num_classes].set(p["lin2_w"].T)
    b3f = jnp.pad(p["lin2_b"], (0, CP - num_classes)).reshape(1, CP)

    # Padded bias lanes must be exactly zero: padded activation lanes/rows rely
    # on relu(0 matmul + 0 bias) == 0 feeding zero fc1 weight rows.
    assert float(jnp.abs(b1c[0, 6:]).max()) == 0.0
    assert float(jnp.abs(b2c[0, 16:]).max()) == 0.0

    return {
        "conv1_w": w1c, "conv1_b": b1c,
        "conv2_w": w2c, "conv2_b": b2c,
        "fc1_w": w1f, "fc1_b": b1f,
        "fc2_w": w2f, "fc2_b": b2f,
        "fc3_w": w3f, "fc3_b": b3f,
    }


# ---------------------------------------------------------------------------
# Forward pass (eval mode: dropouts are identity)
# ---------------------------------------------------------------------------

def mini_flowpicnet_32_forward(x_nchw, packed, num_classes):
    # Input NCHW (B,1,32,32) -> internal NHWC
    x = jnp.transpose(x_nchw, (0, 2, 3, 1)).astype(jnp.float32)      # (B,32,32,1)
    B = x.shape[0]
    bt = _pick_conv_batch_tile(B)

    # Stage 1: conv1(9x9, pad=2) + ReLU + maxpool2x2  (one fused kernel)
    col1, PH1, PW1 = _im2col_pooled(x, 9, 9, 2, NP_PAD1)             # (B,800,81) bf16
    y1 = conv_pool_stage(_pad_batch(col1, bt),
                         packed["conv1_w"], packed["conv1_b"], NP_PAD1, bt)[:B]

    # Back to NHWC for stage 2 im2col: (B,14,14,6)
    f1 = y1[:, :PH1 * PW1, :].reshape(B, PH1, PW1, CP)[:, :, :, :6]

    # Stage 2: conv2 + ReLU + (drop1 = identity) + maxpool2x2  (fused kernel)
    col2, PH2, PW2 = _im2col_pooled(f1, 9, 9, 2, NP_PAD2)            # (B,128,486) bf16
    y2 = conv_pool_stage(_pad_batch(col2, bt),
                         packed["conv2_w"], packed["conv2_b"], NP_PAD2, bt)[:B]

    assert PH2 * PW2 * 16 >= 120  # mirrors the module's flatten-size assert

    # FC head: fc1 weights already permuted to the (hw, c_pad) layout, so the
    # padded pooled map is consumed directly (junk rows/lanes hit zero weights).
    xf = y2.reshape(B, NP_PAD2 * CP)                                  # (B,4096) bf16
    tb = _pick_fc_batch_tile(B)
    logits_p = fc_head(_pad_batch(xf, tb),
                       packed["fc1_w"], packed["fc1_b"],
                       packed["fc2_w"], packed["fc2_b"],
                       packed["fc3_w"], packed["fc3_b"], tb)[:B]      # (B,128)
    return logits_p[:, :num_classes]


# ---------------------------------------------------------------------------
# Main
# ---------------------------------------------------------------------------

if __name__ == "__main__":
    num_classes = 10
    key = jax.random.PRNGKey(0)
    k_x, k_p = jax.random.split(key)

    # Input implied by the module: 1-channel 32x32 "FlowPic" images (flatten=400).
    x = jax.random.normal(k_x, (2, 1, 32, 32), dtype=jnp.float32)
    params = init_params(k_p, num_classes)
    packed = pack_params(params, num_classes, NP_PAD2)

    fwd = jax.jit(lambda xx, pp: mini_flowpicnet_32_forward(xx, pp, num_classes))
    out = jax.block_until_ready(fwd(x, packed))

    assert out.shape == (2, num_classes), out.shape
    assert out.dtype == jnp.float32
    print("KERNEL_OK")
</pallas_src>

<mosaic_0001>
module attributes {stable_mosaic.version = 11 : i64} {
  func.func @_conv_pool_kernel(%arg0: i32, %arg1: memref<1x800x81xbf16, #tpu.memory_space<vmem>>, %arg2: memref<81x128xbf16, #tpu.memory_space<vmem>>, %arg3: memref<1x128xf32, #tpu.memory_space<vmem>>, %arg4: memref<1x200x128xbf16, #tpu.memory_space<vmem>>) attributes {dimension_semantics = [#tpu.dimension_semantics<parallel>], iteration_bounds = array<i64: 2>, scalar_prefetch = 0 : i64, scratch_operands = 0 : i64, tpu.core_type = #tpu.core_type<tc>, window_params = [{transform_indices = @transform_0, window_bounds = array<i64: 1, 800, 81>}, {pipeline_mode = #tpu.pipeline_mode<synchronous>, transform_indices = @transform_1, window_bounds = array<i64: 81, 128>}, {pipeline_mode = #tpu.pipeline_mode<synchronous>, transform_indices = @transform_2, window_bounds = array<i64: 1, 128>}, {transform_indices = @transform_3, window_bounds = array<i64: 1, 200, 128>}]} {
    %c0 = arith.constant 0 : index
    %c0_0 = arith.constant 0 : index
    %c0_1 = arith.constant 0 : index
    %0 = vector.load %arg1[%c0, %c0_0, %c0_1] : memref<1x800x81xbf16, #tpu.memory_space<vmem>>, vector<1x800x81xbf16>
    %1 = vector.shape_cast %0 : vector<1x800x81xbf16> to vector<800x81xbf16>
    %c0_2 = arith.constant 0 : index
    %c0_3 = arith.constant 0 : index
    %2 = vector.load %arg2[%c0_2, %c0_3] : memref<81x128xbf16, #tpu.memory_space<vmem>>, vector<81x128xbf16>
    %cst = arith.constant dense<0.000000e+00> : vector<800x128xf32>
    %3 = tpu.matmul %1, %2, %cst {dimension_numbers = #tpu.dot_dimension_numbers<[1], [0], [0], [1], [0, 0, 1, 1], [], []>} : vector<800x81xbf16>, vector<81x128xbf16>, vector<800x128xf32> -> vector<800x128xf32>
    %4 = vector.shape_cast %3 : vector<800x128xf32> to vector<1x800x128xf32>
    %5 = vector.extract_strided_slice %4 {offsets = [0, 0, 0], sizes = [1, 200, 128], strides = [1, 1, 1]} : vector<1x800x128xf32> to vector<1x200x128xf32>
    %6 = vector.extract_strided_slice %4 {offsets = [0, 200, 0], sizes = [1, 200, 128], strides = [1, 1, 1]} : vector<1x800x128xf32> to vector<1x200x128xf32>
    %7 = arith.maximumf %5, %6 : vector<1x200x128xf32>
    %8 = vector.extract_strided_slice %4 {offsets = [0, 400, 0], sizes = [1, 200, 128], strides = [1, 1, 1]} : vector<1x800x128xf32> to vector<1x200x128xf32>
    %9 = vector.extract_strided_slice %4 {offsets = [0, 600, 0], sizes = [1, 200, 128], strides = [1, 1, 1]} : vector<1x800x128xf32> to vector<1x200x128xf32>
    %10 = arith.maximumf %8, %9 : vector<1x200x128xf32>
    %11 = arith.maximumf %7, %10 : vector<1x200x128xf32>
    %c0_4 = arith.constant 0 : index
    %c0_5 = arith.constant 0 : index
    %12 = vector.load %arg3[%c0_4, %c0_5] : memref<1x128xf32, #tpu.memory_space<vmem>>, vector<1x128xf32>
    %13 = vector.shape_cast %12 : vector<1x128xf32> to vector<1x1x128xf32>
    %14 = vector.broadcast %13 : vector<1x1x128xf32> to vector<1x200x128xf32>
    %15 = arith.addf %11, %14 : vector<1x200x128xf32>
    %cst_6 = arith.constant 0.000000e+00 : f32
    %16 = vector.broadcast %cst_6 : f32 to vector<1x200x128xf32>
    %17 = arith.maximumf %15, %16 : vector<1x200x128xf32>
    %18 = arith.truncf %17 : vector<1x200x128xf32> to vector<1x200x128xbf16>
    %c0_7 = arith.constant 0 : index
    %c0_8 = arith.constant 0 : index
    %c0_9 = arith.constant 0 : index
    %19 = vector.load %arg4[%c0_7, %c0_8, %c0_9] : memref<1x200x128xbf16, #tpu.memory_space<vmem>>, vector<1x200x128xbf16>
    tpu.vector_store %arg4[%c0_7, %c0_8, %c0_9], %18 {strides = array<i32>} : memref<1x200x128xbf16, #tpu.memory_space<vmem>>, vector<1x200x128xbf16>,
    return
  }
  func.func @transform_0(%arg0: i32) -> (i32, i32, i32) {
    %c0_i32 = arith.constant 0 : i32
    %c0_i32_0 = arith.constant 0 : i32
    %c0_i32_1 = arith.constant 0 : i32
    return %arg0, %c0_i32, %c0_i32_0 : i32, i32, i32
  }
  func.func @transform_1(%arg0: i32) -> (i32, i32) {
    %c0_i32 = arith.constant 0 : i32
    %c0_i32_0 = arith.constant 0 : i32
    %c0_i32_1 = arith.constant 0 : i32
    return %c0_i32, %c0_i32_0 : i32, i32
  }
  func.func @transform_2(%arg0: i32) -> (i32, i32) {
    %c0_i32 = arith.constant 0 : i32
    %c0_i32_0 = arith.constant 0 : i32
    %c0_i32_1 = arith.constant 0 : i32
    return %c0_i32, %c0_i32_0 : i32, i32
  }
  func.func @transform_3(%arg0: i32) -> (i32, i32, i32) {
    %c0_i32 = arith.constant 0 : i32
    %c0_i32_0 = arith.constant 0 : i32
    %c0_i32_1 = arith.constant 0 : i32
    return %arg0, %c0_i32, %c0_i32_0 : i32, i32, i32
  }
}

module attributes {stable_mosaic.version = 11 : i64} {
  func.func @_conv_pool_kernel(%arg0: i32, %arg1: memref<1x128x486xbf16, #tpu.memory_space<vmem>>, %arg2: memref<486x128xbf16, #tpu.memory_space<vmem>>, %arg3: memref<1x128xf32, #tpu.memory_space<vmem>>, %arg4: memref<1x32x128xbf16, #tpu.memory_space<vmem>>) attributes {dimension_semantics = [#tpu.dimension_semantics<parallel>], iteration_bounds = array<i64: 2>, scalar_prefetch = 0 : i64, scratch_operands = 0 : i64, tpu.core_type = #tpu.core_type<tc>, window_params = [{transform_indices = @transform_0, window_bounds = array<i64: 1, 128, 486>}, {pipeline_mode = #tpu.pipeline_mode<synchronous>, transform_indices = @transform_1, window_bounds = array<i64: 486, 128>}, {pipeline_mode = #tpu.pipeline_mode<synchronous>, transform_indices = @transform_2, window_bounds = array<i64: 1, 128>}, {transform_indices = @transform_3, window_bounds = array<i64: 1, 32, 128>}]} {
    %c0 = arith.constant 0 : index
    %c0_0 = arith.constant 0 : index
    %c0_1 = arith.constant 0 : index
    %0 = vector.load %arg1[%c0, %c0_0, %c0_1] : memref<1x128x486xbf16, #tpu.memory_space<vmem>>, vector<1x128x486xbf16>
    %1 = vector.shape_cast %0 : vector<1x128x486xbf16> to vector<128x486xbf16>
    %c0_2 = arith.constant 0 : index
    %c0_3 = arith.constant 0 : index
    %2 = vector.load %arg2[%c0_2, %c0_3] : memref<486x128xbf16, #tpu.memory_space<vmem>>, vector<486x128xbf16>
    %cst = arith.constant dense<0.000000e+00> : vector<128x128xf32>
    %3 = tpu.matmul %1, %2, %cst {dimension_numbers = #tpu.dot_dimension_numbers<[1], [0], [0], [1], [0, 0, 1, 1], [], []>} : vector<128x486xbf16>, vector<486x128xbf16>, vector<128x128xf32> -> vector<128x128xf32>
    %4 = vector.shape_cast %3 : vector<128x128xf32> to vector<1x128x128xf32>
    %5 = vector.extract_strided_slice %4 {offsets = [0, 0, 0], sizes = [1, 32, 128], strides = [1, 1, 1]} : vector<1x128x128xf32> to vector<1x32x128xf32>
    %6 = vector.extract_strided_slice %4 {offsets = [0, 32, 0], sizes = [1, 32, 128], strides = [1, 1, 1]} : vector<1x128x128xf32> to vector<1x32x128xf32>
    %7 = arith.maximumf %5, %6 : vector<1x32x128xf32>
    %8 = vector.extract_strided_slice %4 {offsets = [0, 64, 0], sizes = [1, 32, 128], strides = [1, 1, 1]} : vector<1x128x128xf32> to vector<1x32x128xf32>
    %9 = vector.extract_strided_slice %4 {offsets = [0, 96, 0], sizes = [1, 32, 128], strides = [1, 1, 1]} : vector<1x128x128xf32> to vector<1x32x128xf32>
    %10 = arith.maximumf %8, %9 : vector<1x32x128xf32>
    %11 = arith.maximumf %7, %10 : vector<1x32x128xf32>
    %c0_4 = arith.constant 0 : index
    %c0_5 = arith.constant 0 : index
    %12 = vector.load %arg3[%c0_4, %c0_5] : memref<1x128xf32, #tpu.memory_space<vmem>>, vector<1x128xf32>
    %13 = vector.shape_cast %12 : vector<1x128xf32> to vector<1x1x128xf32>
    %14 = vector.broadcast %13 : vector<1x1x128xf32> to vector<1x32x128xf32>
    %15 = arith.addf %11, %14 : vector<1x32x128xf32>
    %cst_6 = arith.constant 0.000000e+00 : f32
    %16 = vector.broadcast %cst_6 : f32 to vector<1x32x128xf32>
    %17 = arith.maximumf %15, %16 : vector<1x32x128xf32>
    %18 = arith.truncf %17 : vector<1x32x128xf32> to vector<1x32x128xbf16>
    %c0_7 = arith.constant 0 : index
    %c0_8 = arith.constant 0 : index
    %c0_9 = arith.constant 0 : index
    %19 = vector.load %arg4[%c0_7, %c0_8, %c0_9] : memref<1x32x128xbf16, #tpu.memory_space<vmem>>, vector<1x32x128xbf16>
    tpu.vector_store %arg4[%c0_7, %c0_8, %c0_9], %18 {strides = array<i32>} : memref<1x32x128xbf16, #tpu.memory_space<vmem>>, vector<1x32x128xbf16>,
    return
  }
  func.func @transform_0(%arg0: i32) -> (i32, i32, i32) {
    %c0_i32 = arith.constant 0 : i32
    %c0_i32_0 = arith.constant 0 : i32
    %c0_i32_1 = arith.constant 0 : i32
    return %arg0, %c0_i32, %c0_i32_0 : i32, i32, i32
  }
  func.func @transform_1(%arg0: i32) -> (i32, i32) {
    %c0_i32 = arith.constant 0 : i32
    %c0_i32_0 = arith.constant 0 : i32
    %c0_i32_1 = arith.constant 0 : i32
    return %c0_i32, %c0_i32_0 : i32, i32
  }
  func.func @transform_2(%arg0: i32) -> (i32, i32) {
    %c0_i32 = arith.constant 0 : i32
    %c0_i32_0 = arith.constant 0 : i32
    %c0_i32_1 = arith.constant 0 : i32
    return %c0_i32, %c0_i32_0 : i32, i32
  }
  func.func @transform_3(%arg0: i32) -> (i32, i32, i32) {
    %c0_i32 = arith.constant 0 : i32
    %c0_i32_0 = arith.constant 0 : i32
    %c0_i32_1 = arith.constant 0 : i32
    return %arg0, %c0_i32, %c0_i32_0 : i32, i32, i32
  }
}

module attributes {stable_mosaic.version = 11 : i64} {
  func.func @_fc_head_kernel(%arg0: i32, %arg1: memref<2x4096xbf16, #tpu.memory_space<vmem>>, %arg2: memref<4096x128xbf16, #tpu.memory_space<vmem>>, %arg3: memref<1x128xf32, #tpu.memory_space<vmem>>, %arg4: memref<128x128xf32, #tpu.memory_space<vmem>>, %arg5: memref<1x128xf32, #tpu.memory_space<vmem>>, %arg6: memref<128x128xf32, #tpu.memory_space<vmem>>, %arg7: memref<1x128xf32, #tpu.memory_space<vmem>>, %arg8: memref<2x128xf32, #tpu.memory_space<vmem>>) attributes {dimension_semantics = [#tpu.dimension_semantics<parallel>], iteration_bounds = array<i64: 1>, scalar_prefetch = 0 : i64, scratch_operands = 0 : i64, tpu.core_type = #tpu.core_type<tc>, window_params = [{transform_indices = @transform_0, window_bounds = array<i64: 2, 4096>}, {pipeline_mode = #tpu.pipeline_mode<synchronous>, transform_indices = @transform_1, window_bounds = array<i64: 4096, 128>}, {pipeline_mode = #tpu.pipeline_mode<synchronous>, transform_indices = @transform_2, window_bounds = array<i64: 1, 128>}, {pipeline_mode = #tpu.pipeline_mode<synchronous>, transform_indices = @transform_3, window_bounds = array<i64: 128, 128>}, {pipeline_mode = #tpu.pipeline_mode<synchronous>, transform_indices = @transform_4, window_bounds = array<i64: 1, 128>}, {pipeline_mode = #tpu.pipeline_mode<synchronous>, transform_indices = @transform_5, window_bounds = array<i64: 128, 128>}, {pipeline_mode = #tpu.pipeline_mode<synchronous>, transform_indices = @transform_6, window_bounds = array<i64: 1, 128>}, {transform_indices = @transform_7, window_bounds = array<i64: 2, 128>}]} {
    %c0 = arith.constant 0 : index
    %c0_0 = arith.constant 0 : index
    %0 = vector.load %arg1[%c0, %c0_0] : memref<2x4096xbf16, #tpu.memory_space<vmem>>, vector<2x4096xbf16>
    %c0_1 = arith.constant 0 : index
    %c0_2 = arith.constant 0 : index
    %1 = vector.load %arg2[%c0_1, %c0_2] : memref<4096x128xbf16, #tpu.memory_space<vmem>>, vector<4096x128xbf16>
    %cst = arith.constant dense<0.000000e+00> : vector<2x128xf32>
    %2 = tpu.matmul %0, %1, %cst {dimension_numbers = #tpu.dot_dimension_numbers<[1], [0], [0], [1], [0, 0, 1, 1], [], []>} : vector<2x4096xbf16>, vector<4096x128xbf16>, vector<2x128xf32> -> vector<2x128xf32>
    %c0_3 = arith.constant 0 : index
    %c0_4 = arith.constant 0 : index
    %3 = vector.load %arg3[%c0_3, %c0_4] : memref<1x128xf32, #tpu.memory_space<vmem>>, vector<1x128xf32>
    %4 = vector.broadcast %3 : vector<1x128xf32> to vector<2x128xf32>
    %5 = arith.addf %2, %4 : vector<2x128xf32>
    %cst_5 = arith.constant 0.000000e+00 : f32
    %6 = vector.broadcast %cst_5 : f32 to vector<2x128xf32>
    %7 = arith.maximumf %5, %6 : vector<2x128xf32>
    %c0_6 = arith.constant 0 : index
    %c0_7 = arith.constant 0 : index
    %8 = vector.load %arg4[%c0_6, %c0_7] : memref<128x128xf32, #tpu.memory_space<vmem>>, vector<128x128xf32>
    %cst_8 = arith.constant dense<0.000000e+00> : vector<2x128xf32>
    %9 = tpu.matmul %7, %8, %cst_8 {dimension_numbers = #tpu.dot_dimension_numbers<[1], [0], [0], [1], [0, 0, 1, 1], [], []>} : vector<2x128xf32>, vector<128x128xf32>, vector<2x128xf32> -> vector<2x128xf32>
    %c0_9 = arith.constant 0 : index
    %c0_10 = arith.constant 0 : index
    %10 = vector.load %arg5[%c0_9, %c0_10] : memref<1x128xf32, #tpu.memory_space<vmem>>, vector<1x128xf32>
    %11 = vector.broadcast %10 : vector<1x128xf32> to vector<2x128xf32>
    %12 = arith.addf %9, %11 : vector<2x128xf32>
    %cst_11 = arith.constant 0.000000e+00 : f32
    %13 = vector.broadcast %cst_11 : f32 to vector<2x128xf32>
    %14 = arith.maximumf %12, %13 : vector<2x128xf32>
    %c0_12 = arith.constant 0 : index
    %c0_13 = arith.constant 0 : index
    %15 = vector.load %arg6[%c0_12, %c0_13] : memref<128x128xf32, #tpu.memory_space<vmem>>, vector<128x128xf32>
    %cst_14 = arith.constant dense<0.000000e+00> : vector<2x128xf32>
    %16 = tpu.matmul %14, %15, %cst_14 {dimension_numbers = #tpu.dot_dimension_numbers<[1], [0], [0], [1], [0, 0, 1, 1], [], []>} : vector<2x128xf32>, vector<128x128xf32>, vector<2x128xf32> -> vector<2x128xf32>
    %c0_15 = arith.constant 0 : index
    %c0_16 = arith.constant 0 : index
    %17 = vector.load %arg7[%c0_15, %c0_16] : memref<1x128xf32, #tpu.memory_space<vmem>>, vector<1x128xf32>
    %18 = vector.broadcast %17 : vector<1x128xf32> to vector<2x128xf32>
    %19 = arith.addf %16, %18 : vector<2x128xf32>
    %c0_17 = arith.constant 0 : index
    %c0_18 = arith.constant 0 : index
    %20 = vector.load %arg8[%c0_17, %c0_18] : memref<2x128xf32, #tpu.memory_space<vmem>>, vector<2x128xf32>
    tpu.vector_store %arg8[%c0_17, %c0_18], %19 {strides = array<i32>} : memref<2x128xf32, #tpu.memory_space<vmem>>, vector<2x128xf32>,
    return
  }
  func.func @transform_0(%arg0: i32) -> (i32, i32) {
    %c0_i32 = arith.constant 0 : i32
    %c0_i32_0 = arith.constant 0 : i32
    return %arg0, %c0_i32 : i32, i32
  }
  func.func @transform_1(%arg0: i32) -> (i32, i32) {
    %c0_i32 = arith.constant 0 : i32
    %c0_i32_0 = arith.constant 0 : i32
    %c0_i32_1 = arith.constant 0 : i32
    return %c0_i32, %c0_i32_0 : i32, i32
  }
  func.func @transform_2(%arg0: i32) -> (i32, i32) {
    %c0_i32 = arith.constant 0 : i32
    %c0_i32_0 = arith.constant 0 : i32
    %c0_i32_1 = arith.constant 0 : i32
    return %c0_i32, %c0_i32_0 : i32, i32
  }
  func.func @transform_3(%arg0: i32) -> (i32, i32) {
    %c0_i32 = arith.constant 0 : i32
    %c0_i32_0 = arith.constant 0 : i32
    %c0_i32_1 = arith.constant 0 : i32
    return %c0_i32, %c0_i32_0 : i32, i32
  }
  func.func @transform_4(%arg0: i32) -> (i32, i32) {
    %c0_i32 = arith.constant 0 : i32
    %c0_i32_0 = arith.constant 0 : i32
    %c0_i32_1 = arith.constant 0 : i32
    return %c0_i32, %c0_i32_0 : i32, i32
  }
  func.func @transform_5(%arg0: i32) -> (i32, i32) {
    %c0_i32 = arith.constant 0 : i32
    %c0_i32_0 = arith.constant 0 : i32
    %c0_i32_1 = arith.constant 0 : i32
    return %c0_i32, %c0_i32_0 : i32, i32
  }
  func.func @transform_6(%arg0: i32) -> (i32, i32) {
    %c0_i32 = arith.constant 0 : i32
    %c0_i32_0 = arith.constant 0 : i32
    %c0_i32_1 = arith.constant 0 : i32
    return %c0_i32, %c0_i32_0 : i32, i32
  }
  func.func @transform_7(%arg0: i32) -> (i32, i32) {
    %c0_i32 = arith.constant 0 : i32
    %c0_i32_0 = arith.constant 0 : i32
    return %arg0, %c0_i32 : i32, i32
  }
}

</mosaic_0001>

<bundles_post_ra>
// kernel: _lambda_.3
= control target key start
LH: loop header
LB: loop body
LE: loop exit
PB: predicated region body
PF: predicated region fallthrough
CT: control target
= control target key end

     0   :  { %s1982_s12 = smov 0   ;;  %s2327_s0 = inlined_call_operand.vmem [shape: bf16[2,800,81], index: 0, kind: input, shape index: {}]   ;;  %s2328_s1 = inlined_call_operand.vmem [shape: bf16[81,128], index: 1, kind: input, shape index: {}]   ;;  %s2329_s2 = inlined_call_operand.vmem [shape: f32[1,128], index: 2, kind: input, shape index: {}]   ;;  %s2330_s3 = inlined_call_operand.vmem [shape: bf16[2,200,128], index: 3, kind: output, shape index: {}]  }
   0x1 LB: > { %s1469_s13 = sadd.s32 4294967295, %s1959_s12   ;;  %p1473_p0 = scmp.ge.s32.totalorder %s1959_s12, 1  ;;  %s1959_s12 = sphi %s1982_s12, %s13_s12  }
   0x2   : > { %p137_p1 = scmp.lt.s32.totalorder %s1959_s12, 3 }
   0x4   : > { %p138_p2 = pnand %p1473_p0, %p137_p1 }
   0x6   : > { %141 = sbr.rel (%p138_p2) target bundleno = 360 (0x168), region = 32 }
   0xd   : > { %v1897_v0 = vld [vmem:[%s2328_s1] sm:$0xff]   ;;  %v1898_v1 = vld [vmem:[%s2328_s1 + $0x8] sm:$0xff]   ;;  %p161_p3 = scmp.lt.s32.totalorder %s1469_s13, 1  ;;  %v1899_v2 = vld [vmem:[%s2328_s1 + $0x10] sm:$0xff]   ;;  %vm717_vm0 = vcmask 1040384   ;;  %vm566_vm1 = vcmask 662528  }
   0xe   : > { %1762 = vmatprep.subr.bf16.mxu0 %v1897_v0  ;;  %1874 = vmatprep.subr.bf16.mxu1 %v1897_v0  ;;  %v1900_v3 = vld [vmem:[%s2328_s1 + $0x18] sm:$0xff]   ;;  %v1902_v4 = vld [vmem:[%s2328_s1 + $0x28] ss:$0 sps:$4 sm:$0x11]   ;;  %v1901_v7 = vld [vmem:[%s2328_s1 + $0x20] sm:$0xff]   ;;  %v1961_v8 = vmov 0  }
   0xf   : > { %1763 = vmatpush3.bf16.msra.mxu0 %v1897_v0  ;;  %1880 = vmatpush3.bf16.msra.mxu1 %v1897_v0  ;;  %s2344_s13 = smov (!%p161_p3, %s1469_s13), 1  ;;  %v719_v9 = vsel %vm717_vm0, 65535, %v1961_v8 }
  0x10   : > { %1764 = vmatprep.subr.bf16.mxu0 %v1898_v1  ;;  %1875 = vmatprep.subr.bf16.mxu1 %v1898_v1  ;;  %s1886_s20 = smul.u32 400, %s2344_s13  ;;  %v721_v10 = vand.u32 %v1902_v4, %v719_v9 }
  0x11   : > { %s1887_s5 = smul.u32 100, %s2344_s13 }
  0x12   : > { %s2008_s25 = scalar_lea.vmem %s2327_s0, %s1886_s20 }
  0x13   : > { %1765 = vmatpush3.bf16.msra.mxu0 %v1898_v1  ;;  %1881 = vmatpush3.bf16.msra.mxu1 %v1898_v1  ;;  %v1903_v5 = vld [vmem:[%s2008_s25] sm:$0xff]   ;;  %v1904_v6 = vld [vmem:[%s2008_s25 + $0xd0] sm:$0xff]   ;;  %v1905_v11 = vld [vmem:[%s2008_s25 + $0x8] sm:$0xff]   ;;  %s2246_s8 = scalar_lea.vmem %s2330_s3, %s1887_s5 }
  0x14   : > { %1766 = vmatprep.subr.bf16.mxu0 %v1899_v2  ;;  %1876 = vmatprep.subr.bf16.mxu1 %v1899_v2  ;;  %v1906_v12 = vld [vmem:[%s2008_s25 + $0xd8] sm:$0xff]   ;;  %v1907_v13 = vld [vmem:[%s2008_s25 + $0x10] sm:$0xff]   ;;  %v1908_v14 = vld [vmem:[%s2008_s25 + $0xe0] sm:$0xff]  }
  0x15   : > { %1774 = vmatprep.mubr.msk.bf16.mxu0 %vm566_vm1, %v1903_v5  ;;  %1826 = vmatprep.mubr.msk.bf16.mxu1 %vm566_vm1, %v1904_v6  ;;  %v1909_v15 = vld [vmem:[%s2008_s25 + $0x18] sm:$0xff]   ;;  %v1910_v16 = vld [vmem:[%s2008_s25 + $0xe8] sm:$0xff]   ;;  %v1911_v17 = vld [vmem:[%s2008_s25 + $0x20] sm:$0xff]  }
  0x16   : > { %v1912_v18 = vld [vmem:[%s2008_s25 + $0xf0] sm:$0xff]   ;;  %v1913_v19 = vld [vmem:[%s2008_s25 + $0x28] sm:$0xff]   ;;  %v1914_v20 = vld [vmem:[%s2008_s25 + $0xf8] sm:$0xff]  }
  0x17   : > { %1767 = vmatpush3.bf16.msra.mxu0 %v1899_v2  ;;  %1882 = vmatpush3.bf16.msra.mxu1 %v1899_v2  ;;  %v1915_v21 = vld [vmem:[%s2008_s25 + $0x30] sm:$0xff]   ;;  %v1916_v22 = vld [vmem:[%s2008_s25 + $0x100] sm:$0xff]   ;;  %v1917_v23 = vld [vmem:[%s2008_s25 + $0x38] sm:$0xff]  }
  0x18   : > { %1768 = vmatprep.subr.bf16.mxu0 %v1900_v3  ;;  %1877 = vmatprep.subr.bf16.mxu1 %v1900_v3  ;;  %v1918_v24 = vld [vmem:[%s2008_s25 + $0x108] sm:$0xff]   ;;  %v1919_v25 = vld [vmem:[%s2008_s25 + $0x40] sm:$0xff]   ;;  %v1920_v26 = vld [vmem:[%s2008_s25 + $0x110] sm:$0xff]  }
  0x19   : > { %v1921_v27 = vld [vmem:[%s2008_s25 + $0x48] sm:$0xff]   ;;  %v1922_v28 = vld [vmem:[%s2008_s25 + $0x118] sm:$0xff]   ;;  %v1923_v29 = vld [vmem:[%s2008_s25 + $0x50] sm:$0xff]  }
  0x1a   : > { %v1924_v30 = vld [vmem:[%s2008_s25 + $0x120] sm:$0xff]   ;;  %v1925_v31 = vld [vmem:[%s2008_s25 + $0x58] sm:$0xff]   ;;  %v1926_v32 = vld [vmem:[%s2008_s25 + $0x128] sm:$0xff]  }
  0x1b   : > { %1769 = vmatpush3.bf16.msra.mxu0 %v1900_v3  ;;  %1883 = vmatpush3.bf16.msra.mxu1 %v1900_v3  ;;  %v1927_v33 = vld [vmem:[%s2008_s25 + $0x60] sm:$0xff]   ;;  %v1928_v34 = vld [vmem:[%s2008_s25 + $0x130] sm:$0xff]   ;;  %v1929_v35 = vld [vmem:[%s2008_s25 + $0x68] sm:$0xff]  }
  0x1c   : > { %1770 = vmatprep.subr.bf16.mxu0 %v1901_v7  ;;  %1878 = vmatprep.subr.bf16.mxu1 %v1901_v7  ;;  %v1930_v36 = vld [vmem:[%s2008_s25 + $0x138] sm:$0xff]   ;;  %v1931_v37 = vld [vmem:[%s2008_s25 + $0x70] sm:$0xff]   ;;  %v1932_v38 = vld [vmem:[%s2008_s25 + $0x140] sm:$0xff]  }
  0x1d   : > { %v1933_v39 = vld [vmem:[%s2008_s25 + $0x78] sm:$0xff]   ;;  %v1934_v40 = vld [vmem:[%s2008_s25 + $0x148] sm:$0xff]   ;;  %v1935_v41 = vld [vmem:[%s2008_s25 + $0x80] sm:$0xff]  }
  0x1e   : > { %v1936_v42 = vld [vmem:[%s2008_s25 + $0x150] sm:$0xff]   ;;  %v1937_v43 = vld [vmem:[%s2008_s25 + $0x88] sm:$0xff]   ;;  %v1938_v44 = vld [vmem:[%s2008_s25 + $0x158] sm:$0xff]  }
  0x1f   : > { %1771 = vmatpush3.bf16.msra.mxu0 %v1901_v7  ;;  %1884 = vmatpush3.bf16.msra.mxu1 %v1901_v7  ;;  %v1939_v45 = vld [vmem:[%s2008_s25 + $0x90] sm:$0xff]   ;;  %v1940_v46 = vld [vmem:[%s2008_s25 + $0x160] sm:$0xff]   ;;  %v1941_v47 = vld [vmem:[%s2008_s25 + $0x98] sm:$0xff]  }
  0x20   : > { %1772 = vmatprep.subr.bf16.mxu0 %v721_v10  ;;  %1879 = vmatprep.subr.bf16.mxu1 %v721_v10  ;;  %v1942_v48 = vld [vmem:[%s2008_s25 + $0x168] sm:$0xff]   ;;  %v1943_v49 = vld [vmem:[%s2008_s25 + $0xa0] sm:$0xff]   ;;  %v1944_v50 = vld [vmem:[%s2008_s25 + $0x170] sm:$0xff]  }
  0x21   : > { %v1945_v51 = vld [vmem:[%s2008_s25 + $0xa8] sm:$0xff]   ;;  %v1946_v52 = vld [vmem:[%s2008_s25 + $0x178] sm:$0xff]   ;;  %v1947_v53 = vld [vmem:[%s2008_s25 + $0xb0] sm:$0xff]  }
  0x22   : > { %v1948_v54 = vld [vmem:[%s2008_s25 + $0x180] sm:$0xff]   ;;  %v1949_v55 = vld [vmem:[%s2008_s25 + $0xb8] sm:$0xff]   ;;  %v1950_v56 = vld [vmem:[%s2008_s25 + $0x188] sm:$0xff]  }
  0x23   : > { %1773 = vmatpush3.bf16.msra.mxu0 %v721_v10  ;;  %1885 = vmatpush3.bf16.msra.mxu1 %v721_v10  ;;  %v1951_v57 = vld [vmem:[%s2008_s25 + $0xc0] sm:$0xff]   ;;  %v1952_v58 = vld [vmem:[%s2008_s25 + $0xc8] sm:$0xff]  }
  0x26   : > { %1775 = vmatmul.mubr.msk.bf16.vlgmr.msra.gmra.mrb[0].mxu0 %vm566_vm1, %v1905_v11  ;;  %1827 = vmatmul.mubr.msk.bf16.vlgmr.msra.gmra.mrb[0].mxu1 %vm566_vm1, %v1906_v12 }
  0x27   : > { %1778 = vmatprep.mubr.msk.bf16.mxu0 %vm566_vm1, %v1907_v13  ;;  %1830 = vmatprep.mubr.msk.bf16.mxu1 %vm566_vm1, %v1908_v14 }
  0x2e   : > { %1779 = vmatmul.mubr.msk.bf16.gmra.mrb[4].mxu0 %vm566_vm1, %v1909_v15  ;;  %1831 = vmatmul.mubr.msk.bf16.gmra.mrb[4].mxu1 %vm566_vm1, %v1910_v16 }
  0x2f   : > { %1782 = vmatprep.mubr.msk.bf16.mxu0 %vm566_vm1, %v1911_v17  ;;  %1834 = vmatprep.mubr.msk.bf16.mxu1 %vm566_vm1, %v1912_v18 }
  0x36   : > { %1783 = vmatmul.mubr.msk.bf16.gmra.mrb[8].mxu0 %vm566_vm1, %v1913_v19  ;;  %1835 = vmatmul.mubr.msk.bf16.gmra.mrb[8].mxu1 %vm566_vm1, %v1914_v20 }
  0x37   : > { %1786 = vmatprep.mubr.msk.bf16.mxu0 %vm566_vm1, %v1915_v21  ;;  %1838 = vmatprep.mubr.msk.bf16.mxu1 %vm566_vm1, %v1916_v22 }
  0x3e   : > { %1787 = vmatmul.mubr.msk.bf16.gmra.mrb[12].mxu0 %vm566_vm1, %v1917_v23  ;;  %1839 = vmatmul.mubr.msk.bf16.gmra.mrb[12].mxu1 %vm566_vm1, %v1918_v24 }
  0x3f   : > { %1790 = vmatprep.mubr.msk.bf16.mxu0 %vm566_vm1, %v1919_v25  ;;  %1842 = vmatprep.mubr.msk.bf16.mxu1 %vm566_vm1, %v1920_v26 }
  0x46   : > { %1791 = vmatmul.mubr.msk.bf16.gmra.mrb[16].mxu0 %vm566_vm1, %v1921_v27  ;;  %1843 = vmatmul.mubr.msk.bf16.gmra.mrb[16].mxu1 %vm566_vm1, %v1922_v28 }
  0x47   : > { %1794 = vmatprep.mubr.msk.bf16.mxu0 %vm566_vm1, %v1923_v29  ;;  %1846 = vmatprep.mubr.msk.bf16.mxu1 %vm566_vm1, %v1924_v30 }
  0x4e   : > { %1795 = vmatmul.mubr.msk.bf16.gmra.mrb[20].mxu0 %vm566_vm1, %v1925_v31  ;;  %1847 = vmatmul.mubr.msk.bf16.gmra.mrb[20].mxu1 %vm566_vm1, %v1926_v32 }
  0x4f   : > { %1798 = vmatprep.mubr.msk.bf16.mxu0 %vm566_vm1, %v1927_v33  ;;  %1850 = vmatprep.mubr.msk.bf16.mxu1 %vm566_vm1, %v1928_v34 }
  0x56   : > { %1799 = vmatmul.mubr.msk.bf16.gmra.mrb[24].mxu0 %vm566_vm1, %v1929_v35  ;;  %1851 = vmatmul.mubr.msk.bf16.gmra.mrb[24].mxu1 %vm566_vm1, %v1930_v36 }
  0x57   : > { %1802 = vmatprep.mubr.msk.bf16.mxu0 %vm566_vm1, %v1931_v37  ;;  %1854 = vmatprep.mubr.msk.bf16.mxu1 %vm566_vm1, %v1932_v38 }
  0x5e   : > { %1803 = vmatmul.mubr.msk.bf16.gmra.mrb[28].mxu0 %vm566_vm1, %v1933_v39  ;;  %1855 = vmatmul.mubr.msk.bf16.gmra.mrb[28].mxu1 %vm566_vm1, %v1934_v40 }
  0x5f   : > { %1806 = vmatprep.mubr.msk.bf16.mxu0 %vm566_vm1, %v1935_v41  ;;  %1858 = vmatprep.mubr.msk.bf16.mxu1 %vm566_vm1, %v1936_v42 }
  0x66   : > { %1807 = vmatmul.mubr.msk.bf16.gmra.mrb[32].mxu0 %vm566_vm1, %v1937_v43  ;;  %1859 = vmatmul.mubr.msk.bf16.gmra.mrb[32].mxu1 %vm566_vm1, %v1938_v44 }
  0x67   : > { %1810 = vmatprep.mubr.msk.bf16.mxu0 %vm566_vm1, %v1939_v45  ;;  %1862 = vmatprep.mubr.msk.bf16.mxu1 %vm566_vm1, %v1940_v46 }
  0x6e   : > { %1811 = vmatmul.mubr.msk.bf16.gmra.mrb[36].mxu0 %vm566_vm1, %v1941_v47  ;;  %1863 = vmatmul.mubr.msk.bf16.gmra.mrb[36].mxu1 %vm566_vm1, %v1942_v48 }
  0x6f   : > { %1814 = vmatprep.mubr.msk.bf16.mxu0 %vm566_vm1, %v1943_v49  ;;  %1866 = vmatprep.mubr.msk.bf16.mxu1 %vm566_vm1, %v1944_v50 }
  0x76   : > { %1815 = vmatmul.mubr.msk.bf16.gmra.mrb[40].mxu0 %vm566_vm1, %v1945_v51  ;;  %1867 = vmatmul.mubr.msk.bf16.gmra.mrb[40].mxu1 %vm566_vm1, %v1946_v52 }
  0x77   : > { %1818 = vmatprep.mubr.msk.bf16.mxu0 %vm566_vm1, %v1947_v53  ;;  %1870 = vmatprep.mubr.msk.bf16.mxu1 %vm566_vm1, %v1948_v54 }
  0x7e   : > { %1819 = vmatmul.mubr.msk.bf16.gmra.mrb[44].mxu0 %vm566_vm1, %v1949_v55  ;;  %1871 = vmatmul.mubr.msk.bf16.gmra.mrb[44].mxu1 %vm566_vm1, %v1950_v56 }
  0x7f   : > { %1822 = vmatprep.mubr.msk.bf16.mxu0 %vm566_vm1, %v1951_v57 }
  0x86   : > { %1823 = vmatmul.mubr.msk.bf16.gmra.mrb[48].mxu0 %vm566_vm1, %v1952_v58  ;;  %v2228_v58 = vld [vmem:[%s2329_s2] ss:$0 sm:$0xff] }
  0xf9   : > { %v2116_v59 = vpop.f32.mrb[0].mxu0  ;;  %v2118_v60 = vpop.f32.mrb[0].mxu1 }
  0xfa   : > { %v2120_v61 = vpop.f32.mrb[1].mxu0  ;;  %v965_v62 = vpop.f32.mrb[1].mxu1 }
  0xfb   : > { %v2122_v63 = vpop.f32.mrb[2].mxu0  ;;  %v2124_v0 = vpop.f32.mrb[2].mxu1 }
  0xfc   : > { %v2126_v1 = vpop.f32.mrb[3].mxu0  ;;  %v2128_v2 = vpop.f32.mrb[3].mxu1 }
  0xfd   : > { %2333 = vst [vmem:[#allocation2_spill] sm:$0xff] %v2126_v1 }
 0x101   : > { %v2130_v3 = vpop.f32.mrb[4].mxu0  ;;  %v2132_v4 = vpop.f32.mrb[4].mxu1 }
 0x102   : > { %v2134_v5 = vpop.f32.mrb[5].mxu0  ;;  %v2136_v6 = vpop.f32.mrb[5].mxu1 }
 0x103   : > { %v2138_v7 = vpop.f32.mrb[6].mxu0  ;;  %v2140_v8 = vpop.f32.mrb[6].mxu1 }
 0x104   : > { %v2142_v9 = vpop.f32.mrb[7].mxu0  ;;  %v2144_v10 = vpop.f32.mrb[7].mxu1 }
 0x109   : > { %v2146_v11 = vpop.f32.mrb[8].mxu0  ;;  %v2148_v12 = vpop.f32.mrb[8].mxu1 }
 0x10a   : > { %v2150_v13 = vpop.f32.mrb[9].mxu0  ;;  %v2152_v14 = vpop.f32.mrb[9].mxu1 }
 0x10b   : > { %v2154_v15 = vpop.f32.mrb[10].mxu0  ;;  %v2156_v16 = vpop.f32.mrb[10].mxu1 }
 0x10c   : > { %v2158_v17 = vpop.f32.mrb[11].mxu0  ;;  %v2160_v18 = vpop.f32.mrb[11].mxu1 }
 0x111   : > { %v2162_v19 = vpop.f32.mrb[12].mxu0  ;;  %v2164_v20 = vpop.f32.mrb[12].mxu1 }
 0x112   : > { %v2166_v21 = vpop.f32.mrb[13].mxu0  ;;  %v2168_v22 = vpop.f32.mrb[13].mxu1 }
 0x113   : > { %v2170_v23 = vpop.f32.mrb[14].mxu0  ;;  %v2172_v24 = vpop.f32.mrb[14].mxu1 }
 0x114   : > { %v2174_v25 = vpop.f32.mrb[15].mxu0  ;;  %v2176_v26 = vpop.f32.mrb[15].mxu1 }
 0x119   : > { %v2178_v27 = vpop.f32.mrb[16].mxu0  ;;  %v2180_v28 = vpop.f32.mrb[16].mxu1 }
 0x11a   : > { %v2182_v29 = vpop.f32.mrb[17].mxu0  ;;  %v2184_v30 = vpop.f32.mrb[17].mxu1 }
 0x11b   : > { %v2186_v31 = vpop.f32.mrb[18].mxu0  ;;  %v2188_v32 = vpop.f32.mrb[18].mxu1 }
 0x11c   : > { %v2190_v33 = vpop.f32.mrb[19].mxu0  ;;  %v2192_v34 = vpop.f32.mrb[19].mxu1 }
 0x121   : > { %v2194_v35 = vpop.f32.mrb[20].mxu0  ;;  %v2196_v36 = vpop.f32.mrb[20].mxu1 }
 0x122   : > { %v2198_v37 = vpop.f32.mrb[21].mxu0  ;;  %v2200_v38 = vpop.f32.mrb[21].mxu1 }
 0x123   : > { %v2202_v39 = vpop.f32.mrb[22].mxu0  ;;  %v2204_v40 = vpop.f32.mrb[22].mxu1 }
 0x124   : > { %v2206_v41 = vpop.f32.mrb[23].mxu0  ;;  %v2208_v42 = vpop.f32.mrb[23].mxu1 }
 0x129   : > { %v2210_v43 = vpop.f32.mrb[24].mxu0  ;;  %v1852_v44 = vpop.f32.mrb[24].mxu1 }
 0x12a   : > { %2334 = vst [vmem:[#allocation3_spill] sm:$0xff] %v2210_v43  ;;  %v1184_v46 = vmax.f32 %v2128_v2, %v1852_v44  ;;  %v2215_v47 = vpop.f32.mrb[25].mxu0  ;;  %v2217_v48 = vpop.f32.mrb[25].mxu1 }
 0x12b   : > { %2335 = vst [vmem:[#allocation4_spill] sm:$0xff] %v2215_v47  ;;  %2336 = vst [vmem:[#allocation5_spill] sm:$0xff] %v2217_v48  ;;  %v1801_v49 = vpop.f32.mrb[26].mxu0  ;;  %v1853_v50 = vpop.f32.mrb[26].mxu1 }
 0x12c   : > { %v1158_v51 = vmax.f32 %v2116_v59, %v1801_v49  ;;  %v1185_v52 = vmax.f32 %v2118_v60, %v1853_v50  ;;  %v2221_v53 = vpop.f32.mrb[27].mxu0  ;;  %v1064_v54 = vpop.f32.mrb[27].mxu1 }
 0x12d   : > { %v1183_v56 = vmax.f32 %v965_v62, %v1064_v54 }
 0x12f   : > { %v1208_v57 = vmax.f32 %v1158_v51, %v1183_v56 }
 0x131   : > { %v1804_v2 = vpop.f32.mrb[28].mxu0  ;;  %v1856_v44 = vpop.f32.mrb[28].mxu1  ;;  %v1240_v54 = vadd.f32 %v2228_v58, %v1208_v57 }
 0x132   : > { %v1161_v45 = vmax.f32 %v2142_v9, %v1804_v2  ;;  %v1188_v59 = vmax.f32 %v2144_v10, %v1856_v44  ;;  %v869_v60 = vpop.f32.mrb[29].mxu0  ;;  %v1077_v49 = vpop.f32.mrb[29].mxu1 }
 0x133   : > { %v1159_v50 = vmax.f32 %v2122_v63, %v869_v60  ;;  %v1186_v55 = vmax.f32 %v2124_v0, %v1077_v49  ;;  %v1805_v62 = vpop.f32.mrb[30].mxu0  ;;  %v1857_v51 = vpop.f32.mrb[30].mxu1  ;;  %v1265_v57 = vmax.f32 %v1240_v54, 0.0 }
 0x134   : > { %v1162_v56 = vmax.f32 %v2130_v3, %v1805_v62  ;;  %v1189_v43 = vmax.f32 %v2132_v4, %v1857_v51  ;;  %v872_v1 = vpop.f32.mrb[31].mxu0  ;;  %v1080_v47 = vpop.f32.mrb[31].mxu1 }
 0x135   : > { %v1209_v9 = vmax.f32 %v1159_v50, %v1184_v46  ;;  %v1211_v2 = vmax.f32 %v1161_v45, %v1186_v55  ;;  %v1160_v10 = vmax.f32 %v2134_v5, %v872_v1  ;;  %v1187_v44 = vmax.f32 %v2136_v6, %v1080_v47 }
 0x137   : > { %v1241_v63 = vadd.f32 %v2228_v58, %v1209_v9  ;;  %v1243_v0 = vadd.f32 %v2228_v58, %v1211_v2  ;;  %v1210_v60 = vmax.f32 %v1160_v10, %v1185_v52  ;;  %v1212_v49 = vmax.f32 %v1162_v56, %v1187_v44 }
 0x139   : > { %v1266_v48 = vmax.f32 %v1241_v63, 0.0  ;;  %v1242_v3 = vadd.f32 %v2228_v58, %v1210_v60  ;;  %v1808_v4 = vpop.f32.mrb[32].mxu0  ;;  %v1860_v62 = vpop.f32.mrb[32].mxu1  ;;  %v1268_v47 = vmax.f32 %v1243_v0, 0.0  ;;  %v1244_v54 = vadd.f32 %v2228_v58, %v1212_v49 }
 0x13a   : > { %v1165_v1 = vmax.f32 %v2158_v17, %v1808_v4  ;;  %v1192_v5 = vmax.f32 %v2160_v18, %v1860_v62  ;;  %v885_v6 = vpop.f32.mrb[33].mxu0  ;;  %v1093_v45 = vpop.f32.mrb[33].mxu1 }
 0x13b   : > { %v1643_v46 = vpack.c.bf16 %v1266_v48, %v1265_v57  ;;  %v1267_v52 = vmax.f32 %v1242_v3, 0.0  ;;  %v1163_v55 = vmax.f32 %v2138_v7, %v885_v6  ;;  %v1809_v50 = vpop.f32.mrb[34].mxu0  ;;  %v1861_v51 = vpop.f32.mrb[34].mxu1  ;;  %v1190_v56 = vmax.f32 %v2140_v8, %v1093_v45 }
 0x13c   : > { %v1166_v9 = vmax.f32 %v2146_v11, %v1809_v50  ;;  %v1193_v17 = vmax.f32 %v2148_v12, %v1861_v51  ;;  %v888_v2 = vpop.f32.mrb[35].mxu0  ;;  %v1096_v18 = vpop.f32.mrb[35].mxu1  ;;  %v1269_v11 = vmax.f32 %v1244_v54, 0.0 }
 0x13d   : > { %1695 = vst [vmem:[%s2246_s8 + $0x8] sm:$0xff] %v1643_v46   ;;  %v1648_v10 = vpack.c.bf16 %v1268_v47, %v1267_v52  ;;  %v1213_v48 = vmax.f32 %v1163_v55, %v1188_v59  ;;  %v1164_v44 = vmax.f32 %v2150_v13, %v888_v2  ;;  %v1191_v63 = vmax.f32 %v2152_v14, %v1096_v18 }
 0x13e   : > { %v1215_v7 = vmax.f32 %v1165_v1, %v1190_v56 }
 0x13f   : > { %1696 = vst [vmem:[%s2246_s8 + $0x10] sm:$0xff] %v1648_v10   ;;  %v1245_v0 = vadd.f32 %v2228_v58, %v1213_v48  ;;  %v1214_v60 = vmax.f32 %v1164_v44, %v1189_v43  ;;  %v1216_v49 = vmax.f32 %v1166_v9, %v1191_v63 }
 0x140   : > { %v1247_v8 = vadd.f32 %v2228_v58, %v1215_v7 }
 0x141   : > { %v1270_v57 = vmax.f32 %v1245_v0, 0.0  ;;  %v1246_v12 = vadd.f32 %v2228_v58, %v1214_v60  ;;  %v1812_v3 = vpop.f32.mrb[36].mxu0  ;;  %v1864_v4 = vpop.f32.mrb[36].mxu1  ;;  %v1248_v52 = vadd.f32 %v2228_v58, %v1216_v49 }
 0x142   : > { %v1169_v59 = vmax.f32 %v2174_v25, %v1812_v3  ;;  %v1196_v13 = vmax.f32 %v2176_v26, %v1864_v4  ;;  %v901_v14 = vpop.f32.mrb[37].mxu0  ;;  %v1109_v62 = vpop.f32.mrb[37].mxu1  ;;  %v1272_v6 = vmax.f32 %v1247_v8, 0.0 }
 0x143   : > { %v1653_v1 = vpack.c.bf16 %v1270_v57, %v1269_v11  ;;  %v1271_v45 = vmax.f32 %v1246_v12, 0.0  ;;  %v1167_v43 = vmax.f32 %v2154_v15, %v901_v14  ;;  %v1813_v46 = vpop.f32.mrb[38].mxu0  ;;  %v1865_v47 = vpop.f32.mrb[38].mxu1  ;;  %v1194_v55 = vmax.f32 %v2156_v16, %v1109_v62 }
 0x144   : > { %v1170_v50 = vmax.f32 %v2162_v19, %v1813_v46  ;;  %v1197_v25 = vmax.f32 %v2164_v20, %v1865_v47  ;;  %v904_v51 = vpop.f32.mrb[39].mxu0  ;;  %v1112_v26 = vpop.f32.mrb[39].mxu1  ;;  %v1273_v19 = vmax.f32 %v1248_v52, 0.0 }
 0x145   : > { %1697 = vst [vmem:[%s2246_s8 + $0x18] sm:$0xff] %v1653_v1   ;;  %v1658_v54 = vpack.c.bf16 %v1272_v6, %v1271_v45  ;;  %v1217_v56 = vmax.f32 %v1167_v43, %v1192_v5  ;;  %v1168_v9 = vmax.f32 %v2166_v21, %v904_v51  ;;  %v1195_v2 = vmax.f32 %v2168_v22, %v1112_v26 }
 0x146   : > { %v1219_v15 = vmax.f32 %v1169_v59, %v1194_v55 }
 0x147   : > { %1698 = vst [vmem:[%s2246_s8 + $0x20] sm:$0xff] %v1658_v54   ;;  %v1249_v18 = vadd.f32 %v2228_v58, %v1217_v56  ;;  %v1218_v10 = vmax.f32 %v1168_v9, %v1193_v17  ;;  %v1220_v48 = vmax.f32 %v1170_v50, %v1195_v2 }
 0x148   : > { %v1251_v16 = vadd.f32 %v2228_v58, %v1219_v15 }
 0x149   : > { %v1274_v44 = vmax.f32 %v1249_v18, 0.0  ;;  %v1250_v20 = vadd.f32 %v2228_v58, %v1218_v10  ;;  %v1816_v63 = vpop.f32.mrb[40].mxu0  ;;  %v1868_v7 = vpop.f32.mrb[40].mxu1  ;;  %v1252_v12 = vadd.f32 %v2228_v58, %v1220_v48 }
 0x14a   : > { %v1173_v5 = vmax.f32 %v2190_v33, %v1816_v63  ;;  %v1200_v21 = vmax.f32 %v2192_v34, %v1868_v7  ;;  %v917_v22 = vpop.f32.mrb[41].mxu0  ;;  %v1125_v0 = vpop.f32.mrb[41].mxu1  ;;  %v1276_v49 = vmax.f32 %v1251_v16, 0.0 }
 0x14b   : > { %v1663_v60 = vpack.c.bf16 %v1274_v44, %v1273_v19  ;;  %v1275_v8 = vmax.f32 %v1250_v20, 0.0  ;;  %v1171_v17 = vmax.f32 %v2170_v23, %v917_v22  ;;  %v1817_v11 = vpop.f32.mrb[42].mxu0  ;;  %v1869_v57 = vpop.f32.mrb[42].mxu1  ;;  %v1198_v3 = vmax.f32 %v2172_v24, %v1125_v0 }
 0x14c   : > { %v1174_v4 = vmax.f32 %v2178_v27, %v1817_v11  ;;  %v1201_v33 = vmax.f32 %v2180_v28, %v1869_v57  ;;  %v920_v59 = vpop.f32.mrb[43].mxu0  ;;  %v1128_v34 = vpop.f32.mrb[43].mxu1  ;;  %v1277_v27 = vmax.f32 %v1252_v12, 0.0  ;;  %v2338_v57 = vld [vmem:[#allocation5_spill] sm:$0xff] }
 0x14d   : > { %1699 = vst [vmem:[%s2246_s8 + $0x28] sm:$0xff] %v1663_v60   ;;  %v1668_v14 = vpack.c.bf16 %v1276_v49, %v1275_v8  ;;  %v1221_v62 = vmax.f32 %v1171_v17, %v1196_v13  ;;  %v1172_v1 = vmax.f32 %v2182_v29, %v920_v59  ;;  %v1199_v6 = vmax.f32 %v2184_v30, %v1128_v34  ;;  %v2339_v59 = vld [vmem:[#allocation4_spill] sm:$0xff] }
 0x14e   : > { %v1223_v23 = vmax.f32 %v1173_v5, %v1198_v3  ;;  %v2337_v17 = vmax.f32 %v2120_v61, %v2221_v53 }
 0x14f   : > { %1700 = vst [vmem:[%s2246_s8 + $0x30] sm:$0xff] %v1668_v14   ;;  %v1253_v45 = vadd.f32 %v2228_v58, %v1221_v62  ;;  %v1222_v43 = vmax.f32 %v1172_v1, %v1197_v25  ;;  %v1224_v46 = vmax.f32 %v1174_v4, %v1199_v6  ;;  %v2340_v62 = vld [vmem:[#allocation2_spill] sm:$0xff] }
 0x150   : > { %v1255_v24 = vadd.f32 %v2228_v58, %v1223_v23 }
 0x151   : > { %v1278_v47 = vmax.f32 %v1253_v45, 0.0  ;;  %v1254_v28 = vadd.f32 %v2228_v58, %v1222_v43  ;;  %v1820_v52 = vpop.f32.mrb[44].mxu0  ;;  %v1872_v55 = vpop.f32.mrb[44].mxu1  ;;  %v1256_v2 = vadd.f32 %v2228_v58, %v1224_v46 }
 0x152   : > { %v1177_v13 = vmax.f32 %v2206_v41, %v1820_v52  ;;  %v1204_v29 = vmax.f32 %v2208_v42, %v1872_v55  ;;  %v933_v30 = vpop.f32.mrb[45].mxu0  ;;  %v1141_v50 = vpop.f32.mrb[45].mxu1  ;;  %v1280_v26 = vmax.f32 %v1255_v24, 0.0 }
 0x153   : > { %v1673_v51 = vpack.c.bf16 %v1278_v47, %v1277_v27  ;;  %v1279_v54 = vmax.f32 %v1254_v28, 0.0  ;;  %v1175_v25 = vmax.f32 %v2186_v31, %v933_v30  ;;  %v1821_v56 = vpop.f32.mrb[46].mxu0  ;;  %v1873_v9 = vpop.f32.mrb[46].mxu1  ;;  %v1202_v15 = vmax.f32 %v2188_v32, %v1141_v50 }
 0x154   : > { %v1178_v18 = vmax.f32 %v2194_v35, %v1821_v56  ;;  %v1205_v41 = vmax.f32 %v2196_v36, %v1873_v9  ;;  %v936_v10 = vpop.f32.mrb[47].mxu0  ;;  %v1144_v42 = vpop.f32.mrb[47].mxu1  ;;  %v1281_v35 = vmax.f32 %v1256_v2, 0.0 }
 0x155   : > { %1701 = vst [vmem:[%s2246_s8 + $0x38] sm:$0xff] %v1673_v51   ;;  %v1678_v48 = vpack.c.bf16 %v1280_v26, %v1279_v54  ;;  %v1225_v16 = vmax.f32 %v1175_v25, %v1200_v21  ;;  %v1176_v19 = vmax.f32 %v2198_v37, %v936_v10  ;;  %v1203_v44 = vmax.f32 %v2200_v38, %v1144_v42 }
 0x156   : > { %v1227_v31 = vmax.f32 %v1177_v13, %v1202_v15 }
 0x157   : > { %1702 = vst [vmem:[%s2246_s8 + $0x40] sm:$0xff] %v1678_v48   ;;  %v1257_v20 = vadd.f32 %v2228_v58, %v1225_v16  ;;  %v1226_v63 = vmax.f32 %v1176_v19, %v1201_v33  ;;  %v1228_v7 = vmax.f32 %v1178_v18, %v1203_v44 }
 0x158   : > { %v1259_v32 = vadd.f32 %v2228_v58, %v1227_v31 }
 0x159   : > { %v1282_v36 = vmax.f32 %v1257_v20, 0.0  ;;  %v1258_v5 = vadd.f32 %v2228_v58, %v1226_v63  ;;  %v1824_v22 = vpop.f32.mrb[48].mxu0  ;;  %v1260_v33 = vadd.f32 %v2228_v58, %v1228_v7 }
 0x15a   : > { %v1181_v21 = vmax.f32 %v1824_v22, %v2204_v40  ;;  %v949_v0 = vpop.f32.mrb[49].mxu0  ;;  %v1284_v38 = vmax.f32 %v1259_v32, 0.0 }
 0x15b   : > { %v1683_v37 = vpack.c.bf16 %v1282_v36, %v1281_v35  ;;  %v1283_v60 = vmax.f32 %v1258_v5, 0.0  ;;  %v1179_v49 = vmax.f32 %v2202_v39, %v949_v0  ;;  %v1825_v8 = vpop.f32.mrb[50].mxu0  ;;  %v2341_v39 = vld [vmem:[#allocation3_spill] sm:$0xff]  ;;  %v1285_v45 = vmax.f32 %v1260_v33, 0.0 }
 0x15c   : > { %v1206_v11 = vmax.f32 %v2337_v17, %v1181_v21  ;;  %v1182_v12 = vmax.f32 %v1825_v8, %v2338_v57  ;;  %v952_v3 = vpop.f32.mrb[51].mxu0  ;;  %v2342_v1 = vmax.f32 %v2340_v62, %v2341_v39 }
 0x15d   : > { %1703 = vst [vmem:[%s2246_s8 + $0x48] sm:$0xff] %v1683_v37   ;;  %v1688_v4 = vpack.c.bf16 %v1284_v38, %v1283_v60  ;;  %v1229_v40 = vmax.f32 %v1179_v49, %v1204_v29  ;;  %v1180_v34 = vmax.f32 %v2339_v59, %v952_v3 }
 0x15e   : > { %v1238_v14 = vadd.f32 %v2228_v58, %v1206_v11  ;;  %v1207_v6 = vmax.f32 %v2342_v1, %v1182_v12 }
 0x15f   : > { %1704 = vst [vmem:[%s2246_s8 + $0x50] sm:$0xff] %v1688_v4   ;;  %v1261_v61 = vadd.f32 %v2228_v58, %v1229_v40  ;;  %v1230_v53 = vmax.f32 %v1180_v34, %v1205_v41 }
 0x160   : > { %v1239_v23 = vadd.f32 %v2228_v58, %v1207_v6  ;;  %v1263_v24 = vmax.f32 %v1238_v14, 0.0 }
 0x161   : > { %v1286_v43 = vmax.f32 %v1261_v61, 0.0  ;;  %v1262_v46 = vadd.f32 %v2228_v58, %v1230_v53 }
 0x162   : > { %v1264_v27 = vmax.f32 %v1239_v23, 0.0 }
 0x163   : > { %v1693_v47 = vpack.c.bf16 %v1286_v43, %v1285_v45  ;;  %v1287_v28 = vmax.f32 %v1262_v46, 0.0 }
 0x164   : > { %v1638_v52 = vpack.c.bf16 %v1264_v27, %v1263_v24 }
 0x165   : > { %1705 = vst [vmem:[%s2246_s8 + $0x58] sm:$0xff] %v1693_v47   ;;  %v1634_v55 = vpack.c.bf16 %v1287_v28, %v1287_v28 }
 0x166   : > { %1639 = vst [vmem:[%s2246_s8] sm:$0xff] %v1638_v52  }
 0x167   : > { %1413 = vst [vmem:[%s2246_s8 + $0x60] sm:$0xf] %v1634_v55 }
 0x168 PF: > { %s13_s12 = sadd.s32 1, %s1959_s12  }
 0x169   : > { %p10_p4 = scmp.ge.s32.totalorder %s13_s12, 4  }
 0x16b   :  { %12 = sbr.rel (!%p10_p4) target bundleno = 1 (0x1), region = 62 }

// kernel: _lambda_.4
= control target key start
LH: loop header
LB: loop body
LE: loop exit
PB: predicated region body
PF: predicated region fallthrough
CT: control target
= control target key end

     0   :  { %s1240_s12 = smov 0   ;;  %s1495_s0 = inlined_call_operand.vmem [shape: bf16[2,128,486], index: 0, kind: input, shape index: {}]   ;;  %s1496_s1 = inlined_call_operand.vmem [shape: bf16[486,128], index: 1, kind: input, shape index: {}]   ;;  %s1497_s2 = inlined_call_operand.vmem [shape: f32[1,128], index: 2, kind: input, shape index: {}]   ;;  %s1498_s3 = inlined_call_operand.vmem [shape: bf16[2,32,128], index: 3, kind: output, shape index: {}]  }
   0x1 LB: > { %s925_s13 = sadd.s32 4294967295, %s1217_s12   ;;  %p929_p0 = scmp.ge.s32.totalorder %s1217_s12, 1  ;;  %s1217_s12 = sphi %s1240_s12, %s13_s12  }
   0x2   : > { %p137_p1 = scmp.lt.s32.totalorder %s1217_s12, 3 }
   0x4   : > { %p138_p2 = pnand %p929_p0, %p137_p1 }
   0x5   : > { %v1132_v0 = vld [vmem:[%s1496_s1 + $0x40] sm:$0xff] (!%p138_p2)   ;;  %v1219_v1 = vmov (!%p138_p2), 0   ;;  %v1135_v4 = vld [vmem:[%s1496_s1 + $0x48] sm:$0xff] (!%p138_p2)   ;;  %v1138_v7 = vld [vmem:[%s1496_s1 + $0x50] sm:$0xff] (!%p138_p2)   ;;  %p161_p3 = scmp.lt.s32.totalorder (!%p138_p2), %s925_s13, 1  ;;  %vm600_vm0 = vcmask (!%p138_p2), 834560  }
   0x6   : > { %141 = sbr.rel (%p138_p2) target bundleno = 341 (0x155), region = 32  ;;  %1093 = vmatprep.subr.bf16.mxu1 (!%p138_p2), %v1219_v1  ;;  %v1255_v2 = vld [vmem:[%s1496_s1 + $0x80] sm:$0xff] (!%p138_p2)   ;;  %1029 = vmatprep.subr.bf16.mxu0 (!%p138_p2), %v1132_v0  ;;  %v1268_v5 = vld [vmem:[%s1496_s1 + $0x88] sm:$0xff] (!%p138_p2)   ;;  %v1280_v8 = vld [vmem:[%s1496_s1 + $0x90] sm:$0xff] (!%p138_p2)   ;;  %vm625_vm1 = vcmask (!%p138_p2), 1042432  }
   0x7   : > { %v1134_v3 = vld [vmem:[%s1496_s1] sm:$0xff] (!%p138_p2)   ;;  %1108 = vmatpush1.bf16.msra.mxu1 (!%p138_p2), %v1255_v2  ;;  %v1137_v6 = vld [vmem:[%s1496_s1 + $0x8] sm:$0xff] (!%p138_p2)   ;;  %v1140_v9 = vld [vmem:[%s1496_s1 + $0x10] sm:$0xff] (!%p138_p2)  }
   0x8   : > { %1030 = vmatpush3.bf16.msra.mxu0 (!%p138_p2), %v1134_v3  ;;  %1094 = vmatprep.subr.bf16.mxu1 (!%p138_p2), %v1219_v1  ;;  %v1141_v10 = vld [vmem:[%s1496_s1 + $0x58] sm:$0xff] (!%p138_p2)   ;;  %v1144_v13 = vld [vmem:[%s1496_s1 + $0x60] sm:$0xff] (!%p138_p2)   ;;  %v1147_v16 = vld [vmem:[%s1496_s1 + $0x68] sm:$0xff] (!%p138_p2)  }
   0x9   : > { %1031 = vmatprep.subr.bf16.mxu0 (!%p138_p2), %v1135_v4  ;;  %v1293_v11 = vld [vmem:[%s1496_s1 + $0x98] sm:$0xff] (!%p138_p2)   ;;  %v1308_v14 = vld [vmem:[%s1496_s1 + $0xa0] sm:$0xff] (!%p138_p2)   ;;  %v1325_v17 = vld [vmem:[%s1496_s1 + $0xa8] sm:$0xff] (!%p138_p2)  }
   0xa   : > { %v1143_v12 = vld [vmem:[%s1496_s1 + $0x18] sm:$0xff] (!%p138_p2)   ;;  %v1146_v15 = vld [vmem:[%s1496_s1 + $0x20] sm:$0xff] (!%p138_p2)   ;;  %v1149_v18 = vld [vmem:[%s1496_s1 + $0x28] sm:$0xff] (!%p138_p2)  }
   0xb   : > { %1109 = vmatpush1.bf16.msra.mxu1 (!%p138_p2), %v1268_v5  ;;  %v1150_v19 = vld [vmem:[%s1496_s1 + $0x70] sm:$0xff] (!%p138_p2)   ;;  %v1153_v22 = vld [vmem:[%s1496_s1 + $0x78] sm:$0xff] (!%p138_p2)   ;;  %v1369_v27 = vld [vmem:[%s1496_s1 + $0xc0] sm:$0xff] (!%p138_p2)  }
   0xc   : > { %1032 = vmatpush3.bf16.msra.mxu0 (!%p138_p2), %v1137_v6  ;;  %1095 = vmatprep.subr.bf16.mxu1 (!%p138_p2), %v1219_v1  ;;  %v1338_v20 = vld [vmem:[%s1496_s1 + $0xb0] sm:$0xff] (!%p138_p2)   ;;  %v1358_v24 = vld [vmem:[%s1496_s1 + $0xb8] sm:$0xff] (!%p138_p2)   ;;  %v1378_v29 = vld [vmem:[%s1496_s1 + $0xc8] sm:$0xff] (!%p138_p2)  }
   0xd   : > { %1033 = vmatprep.subr.bf16.mxu0 %v1138_v7  ;;  %s1500_s13 = smov (!%p161_p3, %s925_s13), 1  ;;  %v1152_v21 = vld [vmem:[%s1496_s1 + $0x30] sm:$0xff]   ;;  %v1155_v25 = vld [vmem:[%s1496_s1 + $0x38] sm:$0xff]   ;;  %v1169_v36 = vld [vmem:[%s1496_s1 + $0xe0] sm:$0xff]  }
   0xe   : > { %s1012_s23 = sshll.u32 %s1500_s13, 8  ;;  %v1389_v32 = vld [vmem:[%s1496_s1 + $0xd0] sm:$0xff]   ;;  %v1165_v34 = vld [vmem:[%s1496_s1 + $0xd8] sm:$0xff]   ;;  %v1170_v38 = vld [vmem:[%s1496_s1 + $0xe8] sm:$0xff]  }
   0xf   : > { %1110 = vmatpush1.bf16.msra.mxu1 %v1280_v8  ;;  %s1343_s5 = scalar_lea.vmem %s1495_s0, %s1012_s23  ;;  %v1174_v39 = vld [vmem:[%s1496_s1 + $0xf0] ss:$0 sps:$4 sm:$0x77]  }
  0x10   : > { %1034 = vmatpush3.bf16.msra.mxu0 %v1140_v9  ;;  %1096 = vmatprep.subr.bf16.mxu1 %v1219_v1  ;;  %v1158_v23 = vld [vmem:[%s1343_s5 + $0x4] ss:$16 sps:$4 sm:$0xff]   ;;  %v1156_v26 = vld [vmem:[%s1343_s5] ss:$16 sps:$4 sm:$0xff]   ;;  %v1177_v30 = vld [vmem:[%s1343_s5 + $0x2c] ss:$16 sps:$4 sm:$0xff]  }
  0x11   : > { %1035 = vmatprep.subr.bf16.mxu0 %v1141_v10  ;;  %661 = vmatprep.mubr.bf16.mxu0 %v1158_v23  ;;  %v1161_v28 = vld [vmem:[%s1343_s5 + $0x24] ss:$16 sps:$4 sm:$0xff]   ;;  %v1163_v31 = vld [vmem:[%s1343_s5 + $0x20] ss:$16 sps:$4 sm:$0xff]   ;;  %v627_v41 = vsel %vm625_vm1, %v1174_v39, 0 }
  0x12   : > { %998 = vmatprep.mubr.msk.bf16.mxu1 %vm600_vm0, %v1177_v30  ;;  %v1166_v33 = vld [vmem:[%s1343_s5 + $0x44] ss:$16 sps:$4 sm:$0xff]   ;;  %v1168_v35 = vld [vmem:[%s1343_s5 + $0x40] ss:$16 sps:$4 sm:$0xff]   ;;  %v1175_v43 = vld [vmem:[%s1343_s5 + $0x28] ss:$16 sps:$4 sm:$0xff]  }
  0x13   : > { %1111 = vmatpush1.bf16.msra.mxu1 %v1293_v11  ;;  %v1171_v37 = vld [vmem:[%s1343_s5 + $0x64] ss:$16 sps:$4 sm:$0xff]   ;;  %v1173_v40 = vld [vmem:[%s1343_s5 + $0x60] ss:$16 sps:$4 sm:$0xff]   ;;  %v1181_v44 = vld [vmem:[%s1343_s5 + $0x4c] ss:$16 sps:$4 sm:$0xff]  }
  0x14   : > { %1036 = vmatpush3.bf16.msra.mxu0 %v1143_v12  ;;  %1097 = vmatprep.subr.bf16.mxu1 %v1219_v1  ;;  %v1178_v42 = vld [vmem:[%s1343_s5 + $0x84] ss:$16 sps:$4 sm:$0xff]   ;;  %v1180_v45 = vld [vmem:[%s1343_s5 + $0x80] ss:$16 sps:$4 sm:$0xff]   ;;  %v1183_v47 = vld [vmem:[%s1343_s5 + $0x48] ss:$16 sps:$4 sm:$0xff]  }
  0x15   : > { %1037 = vmatprep.subr.bf16.mxu0 %v1144_v13  ;;  %v1184_v46 = vld [vmem:[%s1343_s5 + $0xa4] ss:$16 sps:$4 sm:$0xff]   ;;  %v1187_v48 = vld [vmem:[%s1343_s5 + $0x6c] ss:$16 sps:$4 sm:$0xff]   ;;  %v1186_v49 = vld [vmem:[%s1343_s5 + $0xa0] ss:$16 sps:$4 sm:$0xff]  }
  0x16   : > { %v1190_v50 = vld [vmem:[%s1343_s5 + $0xc4] ss:$16 sps:$4 sm:$0xff]   ;;  %v1189_v51 = vld [vmem:[%s1343_s5 + $0x68] ss:$16 sps:$4 sm:$0xff]   ;;  %v1193_v52 = vld [vmem:[%s1343_s5 + $0x8c] ss:$16 sps:$4 sm:$0xff]  }
  0x17   : > { %1112 = vmatpush1.bf16.msra.mxu1 %v1308_v14  ;;  %v1192_v53 = vld [vmem:[%s1343_s5 + $0xc0] ss:$16 sps:$4 sm:$0xff]   ;;  %v1196_v54 = vld [vmem:[%s1343_s5 + $0xe4] ss:$16 sps:$4 sm:$0xff]   ;;  %v1195_v55 = vld [vmem:[%s1343_s5 + $0x88] ss:$16 sps:$4 sm:$0xff]  }
  0x18   : > { %1038 = vmatpush3.bf16.msra.mxu0 %v1146_v15  ;;  %1098 = vmatprep.subr.bf16.mxu1 %v1219_v1  ;;  %v1199_v56 = vld [vmem:[%s1343_s5 + $0xac] ss:$16 sps:$4 sm:$0xff]   ;;  %v1198_v57 = vld [vmem:[%s1343_s5 + $0xe0] ss:$16 sps:$4 sm:$0xff]   ;;  %v1201_v59 = vld [vmem:[%s1343_s5 + $0xa8] ss:$16 sps:$4 sm:$0xff]  }
  0x19   : > { %1039 = vmatprep.subr.bf16.mxu0 %v1147_v16  ;;  %v1204_v58 = vld [vmem:[%s1343_s5 + $0xc] ss:$16 sps:$4 sm:$0xff]   ;;  %v1202_v61 = vld [vmem:[%s1343_s5 + $0x8] ss:$16 sps:$4 sm:$0xff]  }
  0x1a   : > { %v1205_v60 = vld [vmem:[%s1343_s5 + $0xcc] ss:$16 sps:$4 sm:$0xff]   ;;  %v1207_v62 = vld [vmem:[%s1343_s5 + $0xc8] ss:$16 sps:$4 sm:$0xff]  }
  0x1b   : > { %1113 = vmatpush1.bf16.msra.mxu1 %v1325_v17  ;;  %v1208_v63 = vld [vmem:[%s1343_s5 + $0xec] ss:$16 sps:$4 sm:$0xff]   ;;  %v1210_v0 = vld [vmem:[%s1343_s5 + $0xe8] ss:$16 sps:$4 sm:$0xff]   ;;  %s1013_s5 = sshll.u32 %s1500_s13, 4 }
  0x1c   : > { %1040 = vmatpush3.bf16.msra.mxu0 %v1149_v18  ;;  %1099 = vmatprep.subr.bf16.mxu1 %v1219_v1  ;;  %s170_s8 = scalar_lea.vmem %s1498_s3, %s1013_s5 }
  0x1d   : > { %1041 = vmatprep.subr.bf16.mxu0 %v1150_v19 }
  0x1f   : > { %1114 = vmatpush1.bf16.msra.mxu1 %v1338_v20 }
  0x20   : > { %1042 = vmatpush3.bf16.msra.mxu0 %v1152_v21  ;;  %1100 = vmatprep.subr.bf16.mxu1 %v1219_v1 }
  0x21   : > { %1043 = vmatprep.subr.bf16.mxu0 %v1153_v22 }
  0x23   : > { %1115 = vmatpush1.bf16.msra.mxu1 %v1358_v24 }
  0x24   : > { %1044 = vmatpush3.bf16.msra.mxu0 %v1155_v25  ;;  %1101 = vmatprep.subr.bf16.mxu1 %v1219_v1 }
  0x25   : > { %726 = vmatprep.subr.bf16.mxu0 %v1219_v1 }
  0x27   : > { %662 = vmatmul.mubr.bf16.vlgmr.msra.gmra.mrb[0].mxu0 %v1156_v26  ;;  %1116 = vmatpush1.bf16.msra.mxu1 %v1369_v27 }
  0x28   : > { %1102 = vmatprep.subr.bf16.mxu1 %v1219_v1  ;;  %727 = vmatpush1.bf16.msra.mxu0 %v1255_v2 }
  0x29   : > { %669 = vmatprep.mubr.bf16.mxu0 %v1161_v28  ;;  %728 = vmatprep.subr.bf16.mxu0 %v1219_v1 }
  0x2b   : > { %1117 = vmatpush1.bf16.msra.mxu1 %v1378_v29 }
  0x2c   : > { %1103 = vmatprep.subr.bf16.mxu1 %v1219_v1  ;;  %729 = vmatpush1.bf16.msra.mxu0 %v1268_v5 }
  0x2d   : > { %730 = vmatprep.subr.bf16.mxu0 %v1219_v1 }
  0x2f   : > { %670 = vmatmul.mubr.bf16.gmra.mrb[4].mxu0 %v1163_v31  ;;  %1118 = vmatpush1.bf16.msra.mxu1 %v1389_v32 }
  0x30   : > { %1104 = vmatprep.subr.bf16.mxu1 %v1219_v1  ;;  %731 = vmatpush1.bf16.msra.mxu0 %v1280_v8 }
  0x31   : > { %677 = vmatprep.mubr.bf16.mxu0 %v1166_v33  ;;  %732 = vmatprep.subr.bf16.mxu0 %v1219_v1 }
  0x33   : > { %1119 = vmatpush1.bf16.msra.mxu1 %v1165_v34 }
  0x34   : > { %1105 = vmatprep.subr.bf16.mxu1 %v1219_v1  ;;  %733 = vmatpush1.bf16.msra.mxu0 %v1293_v11 }
  0x35   : > { %734 = vmatprep.subr.bf16.mxu0 %v1219_v1 }
  0x37   : > { %678 = vmatmul.mubr.bf16.gmra.mrb[8].mxu0 %v1168_v35  ;;  %1120 = vmatpush1.bf16.msra.mxu1 %v1169_v36 }
  0x38   : > { %1106 = vmatprep.subr.bf16.mxu1 %v1219_v1  ;;  %735 = vmatpush1.bf16.msra.mxu0 %v1308_v14 }
  0x39   : > { %685 = vmatprep.mubr.bf16.mxu0 %v1171_v37  ;;  %736 = vmatprep.subr.bf16.mxu0 %v1219_v1 }
  0x3b   : > { %1121 = vmatpush1.bf16.msra.mxu1 %v1170_v38 }
  0x3c   : > { %1107 = vmatprep.subr.bf16.mxu1 %v1219_v1  ;;  %737 = vmatpush1.bf16.msra.mxu0 %v1325_v17 }
  0x3d   : > { %738 = vmatprep.subr.bf16.mxu0 %v1219_v1 }
  0x3f   : > { %686 = vmatmul.mubr.bf16.gmra.mrb[12].mxu0 %v1173_v40  ;;  %1122 = vmatpush1.bf16.msra.mxu1 %v627_v41 }
  0x40   : > { %739 = vmatpush1.bf16.msra.mxu0 %v1338_v20  ;;  %693 = vmatprep.mubr.bf16.mxu0 %v1178_v42 }
  0x41   : > { %740 = vmatprep.subr.bf16.mxu0 %v1219_v1 }
  0x42   : > { %767 = vmatmul.mubr.bf16.vlgmr.msra.gmra.mrb[0].mxu1 %v1175_v43 }
  0x43   : > { %999 = vmatprep.mubr.msk.bf16.mxu1 %vm600_vm0, %v1181_v44 }
  0x44   : > { %741 = vmatpush1.bf16.msra.mxu0 %v1358_v24 }
  0x45   : > { %742 = vmatprep.subr.bf16.mxu0 %v1219_v1 }
  0x47   : > { %694 = vmatmul.mubr.bf16.gmra.mrb[16].mxu0 %v1180_v45 }
  0x48   : > { %743 = vmatpush1.bf16.msra.mxu0 %v1369_v27  ;;  %701 = vmatprep.mubr.bf16.mxu0 %v1184_v46 }
  0x49   : > { %744 = vmatprep.subr.bf16.mxu0 %v1219_v1 }
  0x4a   : > { %775 = vmatmul.mubr.bf16.gmra.mrb[4].mxu1 %v1183_v47 }
  0x4b   : > { %1000 = vmatprep.mubr.msk.bf16.mxu1 %vm600_vm0, %v1187_v48 }
  0x4c   : > { %745 = vmatpush1.bf16.msra.mxu0 %v1378_v29 }
  0x4d   : > { %746 = vmatprep.subr.bf16.mxu0 %v1219_v1 }
  0x4f   : > { %702 = vmatmul.mubr.bf16.gmra.mrb[20].mxu0 %v1186_v49 }
  0x50   : > { %747 = vmatpush1.bf16.msra.mxu0 %v1389_v32  ;;  %709 = vmatprep.mubr.bf16.mxu0 %v1190_v50 }
  0x51   : > { %748 = vmatprep.subr.bf16.mxu0 %v1219_v1 }
  0x52   : > { %783 = vmatmul.mubr.bf16.gmra.mrb[8].mxu1 %v1189_v51 }
  0x53   : > { %1001 = vmatprep.mubr.msk.bf16.mxu1 %vm600_vm0, %v1193_v52 }
  0x54   : > { %749 = vmatpush1.bf16.msra.mxu0 %v1165_v34 }
  0x55   : > { %750 = vmatprep.subr.bf16.mxu0 %v1219_v1 }
  0x57   : > { %710 = vmatmul.mubr.bf16.gmra.mrb[24].mxu0 %v1192_v53 }
  0x58   : > { %751 = vmatpush1.bf16.msra.mxu0 %v1169_v36  ;;  %717 = vmatprep.mubr.bf16.mxu0 %v1196_v54 }
  0x59   : > { %752 = vmatprep.subr.bf16.mxu0 %v1219_v1 }
  0x5a   : > { %791 = vmatmul.mubr.bf16.gmra.mrb[12].mxu1 %v1195_v55 }
  0x5b   : > { %1002 = vmatprep.mubr.msk.bf16.mxu1 %vm600_vm0, %v1199_v56 }
  0x5c   : > { %753 = vmatpush1.bf16.msra.mxu0 %v1170_v38 }
  0x5d   : > { %754 = vmatprep.subr.bf16.mxu0 %v1219_v1 }
  0x5f   : > { %718 = vmatmul.mubr.bf16.gmra.mrb[28].mxu0 %v1198_v57 }
  0x60   : > { %755 = vmatpush1.bf16.msra.mxu0 %v627_v41  ;;  %997 = vmatprep.mubr.msk.bf16.mxu0 %vm600_vm0, %v1204_v58 }
  0x62   : > { %799 = vmatmul.mubr.bf16.gmra.mrb[16].mxu1 %v1201_v59 }
  0x63   : > { %1003 = vmatprep.mubr.msk.bf16.mxu1 %vm600_vm0, %v1205_v60 }
  0x67   : > { %759 = vmatmul.mubr.bf16.vlgmr.msra.gmra.mrb[32].mxu0 %v1202_v61 }
  0x6a   : > { %807 = vmatmul.mubr.bf16.gmra.mrb[20].mxu1 %v1207_v62 }
  0x6b   : > { %1004 = vmatprep.mubr.msk.bf16.mxu1 %vm600_vm0, %v1208_v63 }
  0x72   : > { %815 = vmatmul.mubr.bf16.gmra.mrb[24].mxu1 %v1210_v0 }
  0xfa   : > { %v1045_v2 = vpop.f32.mrb[0].mxu0 }
  0xfb   : > { %v1046_v1 = vpop.f32.mrb[1].mxu0 }
  0xfc   : > { %v1467_v3 = vadd.f32 %v1046_v1, %v1045_v2  ;;  %v1048_v4 = vpop.f32.mrb[2].mxu0 }
  0xfd   : > { %v1049_v5 = vpop.f32.mrb[3].mxu0 }
  0xfe   : > { %v1469_v6 = vadd.f32 %v1049_v5, %v1048_v4 }
 0x102   : > { %v1051_v7 = vpop.f32.mrb[4].mxu0 }
 0x103   : > { %v1052_v8 = vpop.f32.mrb[5].mxu0 }
 0x104   : > { %v1053_v9 = vadd.f32 %v1052_v8, %v1051_v7  ;;  %v1054_v10 = vpop.f32.mrb[6].mxu0 }
 0x105   : > { %v1055_v11 = vpop.f32.mrb[7].mxu0 }
 0x106   : > { %v1056_v12 = vadd.f32 %v1055_v11, %v1054_v10 }
 0x10a   : > { %v1057_v13 = vpop.f32.mrb[8].mxu0 }
 0x10b   : > { %v1058_v14 = vpop.f32.mrb[9].mxu0 }
 0x10c   : > { %v1059_v15 = vadd.f32 %v1058_v14, %v1057_v13  ;;  %v1060_v16 = vpop.f32.mrb[10].mxu0 }
 0x10d   : > { %v1061_v17 = vpop.f32.mrb[11].mxu0 }
 0x10e   : > { %v1062_v18 = vadd.f32 %v1061_v17, %v1060_v16 }
 0x112   : > { %v1063_v19 = vpop.f32.mrb[12].mxu0 }
 0x113   : > { %v1064_v20 = vpop.f32.mrb[13].mxu0 }
 0x114   : > { %v1065_v21 = vadd.f32 %v1064_v20, %v1063_v19  ;;  %v1066_v22 = vpop.f32.mrb[14].mxu0 }
 0x115   : > { %v768_v23 = vpop.f32.mrb[0].mxu1  ;;  %v1067_v24 = vpop.f32.mrb[15].mxu0 }
 0x116   : > { %v1471_v25 = vadd.f32 %v1053_v9, %v768_v23  ;;  %v770_v26 = vpop.f32.mrb[1].mxu1  ;;  %v1068_v27 = vadd.f32 %v1067_v24, %v1066_v22 }
 0x117   : > { %v771_v28 = vpop.f32.mrb[2].mxu1 }
 0x118   : > { %v1473_v29 = vadd.f32 %v1056_v12, %v771_v28  ;;  %v773_v30 = vpop.f32.mrb[3].mxu1 }
 0x11a   : > { %v1069_v31 = vpop.f32.mrb[16].mxu0 }
 0x11b   : > { %v1070_v32 = vpop.f32.mrb[17].mxu0 }
 0x11c   : > { %v1071_v33 = vadd.f32 %v1070_v32, %v1069_v31  ;;  %v1072_v34 = vpop.f32.mrb[18].mxu0 }
 0x11d   : > { %v776_v35 = vpop.f32.mrb[4].mxu1  ;;  %v1073_v36 = vpop.f32.mrb[19].mxu0 }
 0x11e   : > { %v777_v37 = vadd.f32 %v1059_v15, %v776_v35  ;;  %v778_v38 = vpop.f32.mrb[5].mxu1  ;;  %v1074_v39 = vadd.f32 %v1073_v36, %v1072_v34  ;;  %v1005_v34 = vld [vmem:[%s1497_s2] ss:$0 sm:$0xff] }
 0x11f   : > { %v779_v40 = vpop.f32.mrb[6].mxu1 }
 0x120   : > { %v780_v41 = vadd.f32 %v1062_v18, %v779_v40  ;;  %v781_v42 = vpop.f32.mrb[7].mxu1 }
 0x122   : > { %v1075_v43 = vpop.f32.mrb[20].mxu0 }
 0x123   : > { %v1076_v44 = vpop.f32.mrb[21].mxu0 }
 0x124   : > { %v1077_v45 = vadd.f32 %v1076_v44, %v1075_v43  ;;  %v1078_v46 = vpop.f32.mrb[22].mxu0 }
 0x125   : > { %v784_v47 = vpop.f32.mrb[8].mxu1  ;;  %v1079_v48 = vpop.f32.mrb[23].mxu0 }
 0x126   : > { %v1475_v49 = vadd.f32 %v1065_v21, %v784_v47  ;;  %v786_v50 = vpop.f32.mrb[9].mxu1  ;;  %v1080_v51 = vadd.f32 %v1079_v48, %v1078_v46 }
 0x127   : > { %v787_v52 = vpop.f32.mrb[10].mxu1 }
 0x128   : > { %v825_v53 = vmax.f32 %v1471_v25, %v1475_v49  ;;  %v1479_v54 = vadd.f32 %v1068_v27, %v787_v52  ;;  %v789_v55 = vpop.f32.mrb[11].mxu1 }
 0x12a   : > { %v826_v56 = vmax.f32 %v1473_v29, %v1479_v54  ;;  %v1081_v57 = vpop.f32.mrb[24].mxu0 }
 0x12b   : > { %v1082_v58 = vpop.f32.mrb[25].mxu0 }
 0x12c   : > { %v1083_v59 = vadd.f32 %v1082_v58, %v1081_v57  ;;  %v1084_v60 = vpop.f32.mrb[26].mxu0 }
 0x12d   : > { %v792_v61 = vpop.f32.mrb[12].mxu1  ;;  %v1085_v62 = vpop.f32.mrb[27].mxu0 }
 0x12e   : > { %v793_v63 = vadd.f32 %v1071_v33, %v792_v61  ;;  %v794_v0 = vpop.f32.mrb[13].mxu1  ;;  %v1086_v2 = vadd.f32 %v1085_v62, %v1084_v60 }
 0x12f   : > { %v795_v1 = vpop.f32.mrb[14].mxu1 }
 0x130   : > { %v796_v4 = vadd.f32 %v1074_v39, %v795_v1  ;;  %v797_v5 = vpop.f32.mrb[15].mxu1 }
 0x132   : > { %v1087_v7 = vpop.f32.mrb[28].mxu0 }
 0x133   : > { %v1088_v8 = vpop.f32.mrb[29].mxu0 }
 0x134   : > { %v1089_v9 = vadd.f32 %v1088_v8, %v1087_v7  ;;  %v1090_v10 = vpop.f32.mrb[30].mxu0 }
 0x135   : > { %v800_v11 = vpop.f32.mrb[16].mxu1  ;;  %v1091_v12 = vpop.f32.mrb[31].mxu0 }
 0x136   : > { %v801_v13 = vadd.f32 %v1077_v45, %v800_v11  ;;  %v802_v14 = vpop.f32.mrb[17].mxu1  ;;  %v1092_v15 = vadd.f32 %v1091_v12, %v1090_v10 }
 0x137   : > { %v803_v16 = vpop.f32.mrb[18].mxu1 }
 0x138   : > { %v804_v17 = vadd.f32 %v1080_v51, %v803_v16  ;;  %v805_v18 = vpop.f32.mrb[19].mxu1 }
 0x13a   : > { %v760_v19 = vpop.f32.mrb[32].mxu0 }
 0x13b   : > { %v761_v20 = vadd.f32 %v1467_v3, %v760_v19  ;;  %v762_v21 = vpop.f32.mrb[33].mxu0 }
 0x13c   : > { %v763_v22 = vpop.f32.mrb[34].mxu0 }
 0x13d   : > { %v823_v23 = vmax.f32 %v761_v20, %v777_v37  ;;  %v764_v24 = vadd.f32 %v1469_v6, %v763_v22  ;;  %v808_v25 = vpop.f32.mrb[20].mxu1  ;;  %v765_v26 = vpop.f32.mrb[35].mxu0 }
 0x13e   : > { %v809_v27 = vadd.f32 %v1083_v59, %v808_v25  ;;  %v810_v28 = vpop.f32.mrb[21].mxu1 }
 0x13f   : > { %v824_v29 = vmax.f32 %v764_v24, %v780_v41  ;;  %v811_v30 = vpop.f32.mrb[22].mxu1 }
 0x140   : > { %v827_v31 = vmax.f32 %v793_v63, %v809_v27  ;;  %v812_v32 = vadd.f32 %v1086_v2, %v811_v30  ;;  %v813_v33 = vpop.f32.mrb[23].mxu1 }
 0x142   : > { %v831_v3 = vmax.f32 %v823_v23, %v827_v31  ;;  %v828_v35 = vmax.f32 %v796_v4, %v812_v32 }
 0x144   : > { %v842_v36 = vadd.f32 %v1005_v34, %v831_v3  ;;  %v832_v37 = vmax.f32 %v824_v29, %v828_v35 }
 0x145   : > { %v816_v38 = vpop.f32.mrb[24].mxu1 }
 0x146   : > { %v843_v6 = vadd.f32 %v1005_v34, %v832_v37  ;;  %v817_v39 = vadd.f32 %v1089_v9, %v816_v38  ;;  %v818_v40 = vpop.f32.mrb[25].mxu1  ;;  %v846_v43 = vmax.f32 %v842_v36, 0.0 }
 0x147   : > { %v819_v42 = vpop.f32.mrb[26].mxu1 }
 0x148   : > { %v847_v41 = vmax.f32 %v843_v6, 0.0  ;;  %v829_v44 = vmax.f32 %v801_v13, %v817_v39  ;;  %v820_v45 = vadd.f32 %v1092_v15, %v819_v42  ;;  %v821_v46 = vpop.f32.mrb[27].mxu1 }
 0x14a   : > { %v1021_v47 = vpack.c.bf16 %v847_v41, %v846_v43  ;;  %v833_v48 = vmax.f32 %v825_v53, %v829_v44  ;;  %v830_v49 = vmax.f32 %v804_v17, %v820_v45 }
 0x14c   : > { %1022 = vst [vmem:[%s170_s8] sm:$0xff] %v1021_v47   ;;  %v844_v50 = vadd.f32 %v1005_v34, %v833_v48  ;;  %v834_v51 = vmax.f32 %v826_v56, %v830_v49 }
 0x14e   : > { %v845_v52 = vadd.f32 %v1005_v34, %v834_v51  ;;  %v848_v54 = vmax.f32 %v844_v50, 0.0 }
 0x150   : > { %v849_v55 = vmax.f32 %v845_v52, 0.0 }
 0x152   : > { %v1026_v57 = vpack.c.bf16 %v849_v55, %v848_v54 }
 0x154   : > { %1028 = vst [vmem:[%s170_s8 + $0x8] sm:$0xff] %v1026_v57  }
 0x155 PF: > { %s13_s12 = sadd.s32 1, %s1217_s12  }
 0x156   : > { %p10_p4 = scmp.ge.s32.totalorder %s13_s12, 4  }
 0x158   :  { %12 = sbr.rel (!%p10_p4) target bundleno = 1 (0x1), region = 62 }

// kernel: _lambda_.5
= control target key start
LH: loop header
LB: loop body
LE: loop exit
PB: predicated region body
PF: predicated region fallthrough
CT: control target
= control target key end

     0   :  { %v559_v28 = vlaneseq  ;;  %v4214_v36 = vmov 1966171168   ;;  %s5218_s0 = inlined_call_operand.vmem [shape: bf16[2,4096], index: 0, kind: input, shape index: {}]   ;;  %s5219_s1 = inlined_call_operand.vmem [shape: bf16[4096,128], index: 1, kind: input, shape index: {}]   ;;  %s5220_s2 = inlined_call_operand.vmem [shape: f32[1,128], index: 2, kind: input, shape index: {}]   ;;  %s5221_s3 = inlined_call_operand.vmem [shape: f32[128,128], index: 3, kind: input, shape index: {}]   ;;  %s5222_s4 = inlined_call_operand.vmem [shape: f32[1,128], index: 4, kind: input, shape index: {}]   ;;  %s5223_s5 = inlined_call_operand.vmem [shape: f32[128,128], index: 5, kind: input, shape index: {}]   ;;  %s5224_s6 = inlined_call_operand.vmem [shape: f32[1,128], index: 6, kind: input, shape index: {}]   ;;  %s5225_s7 = inlined_call_operand.hbm [shape: f32[2,128], index: 7, kind: output, shape index: {}]  }
   0x1   :  { %v3930_v0 = vld [vmem:[%s5219_s1 + $0x40] sm:$0xff]   ;;  %v3934_v4 = vld [vmem:[%s5219_s1 + $0x48] sm:$0xff]   ;;  %v3938_v8 = vld [vmem:[%s5219_s1 + $0x50] sm:$0xff]   ;;  %v557_v37 = vunpack.c.l.s4 %v4214_v36 }
   0x2   :  { %v3931_v1 = vld [vmem:[%s5219_s1 + $0xc0] sm:$0xff]   ;;  %3421 = vmatprep.subr.bf16.mxu0 %v3930_v0  ;;  %v3935_v5 = vld [vmem:[%s5219_s1 + $0xc8] sm:$0xff]   ;;  %v3939_v9 = vld [vmem:[%s5219_s1 + $0xd0] sm:$0xff]   ;;  %v560_v33 = vshrl.u32 %v559_v28, 7 }
   0x3   :  { %v3932_v2 = vld [vmem:[%s5219_s1] sm:$0xff]   ;;  %3443 = vmatprep.subr.bf16.mxu1 %v3931_v1  ;;  %v3936_v6 = vld [vmem:[%s5219_s1 + $0x8] sm:$0xff]   ;;  %v3940_v10 = vld [vmem:[%s5219_s1 + $0x10] sm:$0xff]   ;;  %v558_v40 = vunpack.c.0.s8 %v557_v37 }
   0x4   :  { %v3933_v3 = vld [vmem:[%s5219_s1 + $0x80] sm:$0xff]   ;;  %3422 = vmatpush3.bf16.msra.mxu0 %v3932_v2  ;;  %v3937_v7 = vld [vmem:[%s5219_s1 + $0x88] sm:$0xff]   ;;  %v3941_v11 = vld [vmem:[%s5219_s1 + $0x90] sm:$0xff]  }
   0x5   :  { %3444 = vmatpush3.bf16.msra.mxu1 %v3933_v3  ;;  %3423 = vmatprep.subr.bf16.mxu0 %v3934_v4  ;;  %v3942_v12 = vld [vmem:[%s5219_s1 + $0x58] sm:$0xff]   ;;  %v3946_v16 = vld [vmem:[%s5219_s1 + $0x60] sm:$0xff]   ;;  %v3950_v20 = vld [vmem:[%s5219_s1 + $0x68] sm:$0xff]   ;;  %v4364_v41 = vsub.s32 %v558_v40, %v560_v33 }
   0x6   :  { %3445 = vmatprep.subr.bf16.mxu1 %v3935_v5  ;;  %v3943_v13 = vld [vmem:[%s5219_s1 + $0xd8] sm:$0xff]   ;;  %v3947_v17 = vld [vmem:[%s5219_s1 + $0xe0] sm:$0xff]   ;;  %v3951_v21 = vld [vmem:[%s5219_s1 + $0xe8] sm:$0xff]  }
   0x7   :  { %v3944_v14 = vld [vmem:[%s5219_s1 + $0x18] sm:$0xff]   ;;  %v3948_v18 = vld [vmem:[%s5219_s1 + $0x20] sm:$0xff]   ;;  %v3952_v22 = vld [vmem:[%s5219_s1 + $0x28] sm:$0xff]  }
   0x8   :  { %3424 = vmatpush3.bf16.msra.mxu0 %v3936_v6  ;;  %v3945_v15 = vld [vmem:[%s5219_s1 + $0x98] sm:$0xff]   ;;  %v3949_v19 = vld [vmem:[%s5219_s1 + $0xa0] sm:$0xff]   ;;  %v3953_v23 = vld [vmem:[%s5219_s1 + $0xa8] sm:$0xff]  }
   0x9   :  { %3446 = vmatpush3.bf16.msra.mxu1 %v3937_v7  ;;  %3425 = vmatprep.subr.bf16.mxu0 %v3938_v8  ;;  %v3954_v24 = vld [vmem:[%s5219_s1 + $0x70] sm:$0xff]   ;;  %v3958_v29 = vld [vmem:[%s5219_s1 + $0x78] sm:$0xff]   ;;  %v28_v34 = vld [vmem:[%s5218_s0] sm:$0xff] }
   0xa   :  { %3447 = vmatprep.subr.bf16.mxu1 %v3939_v9  ;;  %v3955_v25 = vld [vmem:[%s5219_s1 + $0xf0] sm:$0xff]   ;;  %v3959_v30 = vld [vmem:[%s5219_s1 + $0xf8] sm:$0xff]   ;;  %v3963_v35 = vld [vmem:[%s5219_s1 + $0x140] sm:$0xff]   ;;  %v555_v39 = vcombine.high %v28_v34, %v28_v34  ;;  %v562_v42 = vrot.slane %v28_v34, %v4364_v41 }
   0xb   :  { %v3956_v26 = vld [vmem:[%s5219_s1 + $0x30] sm:$0xff]   ;;  %v3960_v31 = vld [vmem:[%s5219_s1 + $0x38] sm:$0xff]   ;;  %v3964_v38 = vld [vmem:[%s5219_s1 + $0x1c0] sm:$0xff]  }
   0xc   :  { %3426 = vmatpush3.bf16.msra.mxu0 %v3940_v10  ;;  %v3957_v27 = vld [vmem:[%s5219_s1 + $0xb0] sm:$0xff]   ;;  %v3961_v32 = vld [vmem:[%s5219_s1 + $0xb8] sm:$0xff]   ;;  %v4368_v43 = vrot.slane %v555_v39, %v4364_v41  ;;  %v570_v44 = vcombine.high %v562_v42, %v562_v42  ;;  %v578_v45 = vrot.slane %v562_v42, %v4364_v41  ;;  %v3965_v47 = vld [vmem:[%s5219_s1 + $0x100] sm:$0xff]  }
   0xd   :  { %3448 = vmatpush3.bf16.msra.mxu1 %v3941_v11  ;;  %3427 = vmatprep.subr.bf16.mxu0 %v3942_v12  ;;  %v3966_v49 = vld [vmem:[%s5219_s1 + $0x180] sm:$0xff]   ;;  %v3967_v52 = vld [vmem:[%s5219_s1 + $0x148] sm:$0xff]   ;;  %v3971_v58 = vld [vmem:[%s5219_s1 + $0x150] sm:$0xff]  }
   0xe   :  { %3449 = vmatprep.subr.bf16.mxu1 %v3943_v13  ;;  %v571_v46 = vcombine.high %v4368_v43, %v4368_v43  ;;  %v592_v48 = vrot.slane %v570_v44, %v4364_v41  ;;  %v600_v51 = vcombine.high %v578_v45, %v578_v45  ;;  %v3968_v54 = vld [vmem:[%s5219_s1 + $0x1c8] sm:$0xff]   ;;  %v3972_v59 = vld [vmem:[%s5219_s1 + $0x1d0] sm:$0xff]   ;;  %v3975_v62 = vld [vmem:[%s5219_s1 + $0x158] sm:$0xff]  }
   0xf   :  { %v3969_v55 = vld [vmem:[%s5219_s1 + $0x108] sm:$0xff]   ;;  %v3973_v60 = vld [vmem:[%s5219_s1 + $0x110] sm:$0xff]   ;;  %v3976_v63 = vld [vmem:[%s5219_s1 + $0x1d8] sm:$0xff]  }
  0x10   :  { %3428 = vmatpush3.bf16.msra.mxu0 %v3944_v14  ;;  %v599_v50 = vrot.slane %v571_v46, %v4364_v41  ;;  %2351 = vmatprep.mubr.bf16.mxu0 %v592_v48  ;;  %v602_v53 = vcombine.high %v592_v48, %v592_v48  ;;  %v3970_v57 = vld [vmem:[%s5219_s1 + $0x188] sm:$0xff]   ;;  %v3974_v61 = vld [vmem:[%s5219_s1 + $0x190] sm:$0xff]   ;;  %v3977_v0 = vld [vmem:[%s5219_s1 + $0x118] sm:$0xff]  }
  0x11   :  { %3450 = vmatpush3.bf16.msra.mxu1 %v3945_v15  ;;  %3429 = vmatprep.subr.bf16.mxu0 %v3946_v16  ;;  %v3978_v1 = vld [vmem:[%s5219_s1 + $0x198] sm:$0xff]   ;;  %v3979_v2 = vld [vmem:[%s5219_s1 + $0x160] sm:$0xff]   ;;  %v3983_v6 = vld [vmem:[%s5219_s1 + $0x168] sm:$0xff]  }
  0x12   :  { %3451 = vmatprep.subr.bf16.mxu1 %v3947_v17  ;;  %v603_v56 = vcombine.high %v599_v50, %v599_v50  ;;  %2391 = vmatprep.mubr.bf16.mxu1 %v602_v53  ;;  %v3980_v3 = vld [vmem:[%s5219_s1 + $0x1e0] sm:$0xff]   ;;  %v3984_v7 = vld [vmem:[%s5219_s1 + $0x1e8] sm:$0xff]   ;;  %v3987_v10 = vld [vmem:[%s5219_s1 + $0x170] sm:$0xff]  }
  0x13   :  { %v3981_v4 = vld [vmem:[%s5219_s1 + $0x120] sm:$0xff]   ;;  %v3985_v8 = vld [vmem:[%s5219_s1 + $0x128] sm:$0xff]   ;;  %v3988_v11 = vld [vmem:[%s5219_s1 + $0x1f0] sm:$0xff]  }
  0x14   :  { %3430 = vmatpush3.bf16.msra.mxu0 %v3948_v18  ;;  %v3982_v5 = vld [vmem:[%s5219_s1 + $0x1a0] sm:$0xff]   ;;  %v3986_v9 = vld [vmem:[%s5219_s1 + $0x1a8] sm:$0xff]   ;;  %v3989_v12 = vld [vmem:[%s5219_s1 + $0x130] sm:$0xff]   ;;  %v585_v18 = vrot.slane %v4368_v43, %v4364_v41 }
  0x15   :  { %3452 = vmatpush3.bf16.msra.mxu1 %v3949_v19  ;;  %3431 = vmatprep.subr.bf16.mxu0 %v3950_v20  ;;  %v3990_v13 = vld [vmem:[%s5219_s1 + $0x1b0] sm:$0xff]   ;;  %v3991_v14 = vld [vmem:[%s5219_s1 + $0x178] sm:$0xff]   ;;  %v3995_v19 = vld [vmem:[%s5219_s1 + $0x240] sm:$0xff]  }
  0x16   :  { %3453 = vmatprep.subr.bf16.mxu1 %v3951_v21  ;;  %v3992_v15 = vld [vmem:[%s5219_s1 + $0x1f8] sm:$0xff]   ;;  %v3996_v20 = vld [vmem:[%s5219_s1 + $0x2c0] sm:$0xff]   ;;  %v4003_v28 = vld [vmem:[%s5219_s1 + $0x250] sm:$0xff]  }
  0x17   :  { %v3993_v16 = vld [vmem:[%s5219_s1 + $0x138] sm:$0xff]   ;;  %v3997_v21 = vld [vmem:[%s5219_s1 + $0x200] sm:$0xff]   ;;  %v4015_v40 = vld [vmem:[%s5219_s1 + $0x268] sm:$0xff]  }
  0x18   :  { %3432 = vmatpush3.bf16.msra.mxu0 %v3952_v22  ;;  %v3994_v17 = vld [vmem:[%s5219_s1 + $0x1b8] sm:$0xff]   ;;  %v3998_v22 = vld [vmem:[%s5219_s1 + $0x280] sm:$0xff]   ;;  %v4016_v42 = vld [vmem:[%s5219_s1 + $0x2e8] sm:$0xff]  }
  0x19   :  { %3454 = vmatpush3.bf16.msra.mxu1 %v3953_v23  ;;  %3433 = vmatprep.subr.bf16.mxu0 %v3954_v24  ;;  %v601_v23 = vcombine.high %v585_v18, %v585_v18  ;;  %v3999_v24 = vld [vmem:[%s5219_s1 + $0x248] sm:$0xff]   ;;  %v4008_v33 = vld [vmem:[%s5219_s1 + $0x2d8] sm:$0xff]   ;;  %v4011_v36 = vld [vmem:[%s5219_s1 + $0x260] sm:$0xff]  }
  0x1a   :  { %3455 = vmatprep.subr.bf16.mxu1 %v3955_v25  ;;  %v4000_v25 = vld [vmem:[%s5219_s1 + $0x2c8] sm:$0xff]   ;;  %v4009_v34 = vld [vmem:[%s5219_s1 + $0x218] sm:$0xff]   ;;  %v4012_v37 = vld [vmem:[%s5219_s1 + $0x2e0] sm:$0xff]  }
  0x1b   :  { %v4014_v39 = vld [vmem:[%s5219_s1 + $0x2a0] sm:$0xff]   ;;  %v4017_v43 = vld [vmem:[%s5219_s1 + $0x228] sm:$0xff]  }
  0x1c   :  { %3434 = vmatpush3.bf16.msra.mxu0 %v3956_v26  ;;  %v4001_v26 = vld [vmem:[%s5219_s1 + $0x208] sm:$0xff]  }
  0x1d   :  { %3456 = vmatpush3.bf16.msra.mxu1 %v3957_v27  ;;  %3435 = vmatprep.subr.bf16.mxu0 %v3958_v29  ;;  %v4002_v27 = vld [vmem:[%s5219_s1 + $0x288] sm:$0xff]   ;;  %v4004_v29 = vld [vmem:[%s5219_s1 + $0x2d0] sm:$0xff]  }
  0x1e   :  { %3457 = vmatprep.subr.bf16.mxu1 %v3959_v30  ;;  %v4005_v30 = vld [vmem:[%s5219_s1 + $0x210] sm:$0xff]   ;;  %v4018_v44 = vld [vmem:[%s5219_s1 + $0x2a8] sm:$0xff]  }
  0x1f   :  { %v29_v46 = vld [vmem:[%s5218_s0 + $0x8] sm:$0xff] }
  0x20   :  { %3436 = vmatpush3.bf16.msra.mxu0 %v3960_v31  ;;  %v4006_v31 = vld [vmem:[%s5219_s1 + $0x290] sm:$0xff]   ;;  %v611_v48 = vrot.slane %v29_v46, %v4364_v41 }
  0x21   :  { %3458 = vmatpush3.bf16.msra.mxu1 %v3961_v32  ;;  %3465 = vmatprep.subr.bf16.mxu0 %v3963_v35  ;;  %v4007_v32 = vld [vmem:[%s5219_s1 + $0x258] sm:$0xff]  }
  0x22   :  { %3487 = vmatprep.subr.bf16.mxu1 %v3964_v38  ;;  %v4010_v35 = vld [vmem:[%s5219_s1 + $0x298] sm:$0xff]   ;;  %v4013_v38 = vld [vmem:[%s5219_s1 + $0x220] sm:$0xff]  }
  0x23   :  { %2352 = vmatmul.mubr.bf16.vlgmr.msra.gmra.mrb[0].mxu0 %v578_v45  ;;  %v4019_v45 = vld [vmem:[%s5219_s1 + $0x270] sm:$0xff]  }
  0x24   :  { %3466 = vmatpush3.bf16.msra.mxu0 %v3965_v47  ;;  %2392 = vmatmul.mubr.bf16.vlgmr.msra.gmra.mrb[0].mxu1 %v600_v51  ;;  %v4020_v47 = vld [vmem:[%s5219_s1 + $0x2f0] sm:$0xff]  }
  0x25   :  { %3467 = vmatprep.subr.bf16.mxu0 %v3967_v52  ;;  %3488 = vmatpush3.bf16.msra.mxu1 %v3966_v49  ;;  %v604_v49 = vcombine.high %v29_v46, %v29_v46  ;;  %v4022_v51 = vld [vmem:[%s5219_s1 + $0x2b0] sm:$0xff]   ;;  %v619_v52 = vcombine.high %v611_v48, %v611_v48 }
  0x26   :  { %2431 = vmatprep.mubr.bf16.mxu0 %v599_v50  ;;  %3489 = vmatprep.subr.bf16.mxu1 %v3968_v54  ;;  %v4021_v50 = vld [vmem:[%s5219_s1 + $0x230] sm:$0xff]   ;;  %v4023_v54 = vld [vmem:[%s5219_s1 + $0x278] sm:$0xff]  }
  0x27   :  { %2471 = vmatprep.mubr.bf16.mxu1 %v603_v56  ;;  %v4556_v53 = vrot.slane %v604_v49, %v4364_v41  ;;  %v641_v56 = vrot.slane %v619_v52, %v4364_v41  ;;  %v4070_v46 = vld [vmem:[%s5219_s1 + $0x410] sm:$0xff]   ;;  %v4073_v49 = vld [vmem:[%s5219_s1 + $0x4d8] sm:$0xff]   ;;  %v4076_v52 = vld [vmem:[%s5219_s1 + $0x460] sm:$0xff]  }
  0x28   :  { %3468 = vmatpush3.bf16.msra.mxu0 %v3969_v55  ;;  %v4024_v55 = vld [vmem:[%s5219_s1 + $0x2f8] sm:$0xff]  }
  0x29   :  { %3469 = vmatprep.subr.bf16.mxu0 %v3971_v58  ;;  %3490 = vmatpush3.bf16.msra.mxu1 %v3970_v57  ;;  %v620_v57 = vcombine.high %v4556_v53, %v4556_v53  ;;  %v4025_v58 = vld [vmem:[%s5219_s1 + $0x238] sm:$0xff]  }
  0x2a   :  { %3491 = vmatprep.subr.bf16.mxu1 %v3972_v59  ;;  %v4026_v59 = vld [vmem:[%s5219_s1 + $0x2b8] sm:$0xff]  }
  0x2c   :  { %3470 = vmatpush3.bf16.msra.mxu0 %v3973_v60  ;;  %v651_v60 = vcombine.high %v641_v56, %v641_v56 }
  0x2d   :  { %3471 = vmatprep.subr.bf16.mxu0 %v3975_v62  ;;  %3492 = vmatpush3.bf16.msra.mxu1 %v3974_v61  ;;  %v627_v61 = vrot.slane %v611_v48, %v4364_v41  ;;  %v4027_v62 = vld [vmem:[%s5219_s1 + $0x340] sm:$0xff]   ;;  %v4072_v48 = vld [vmem:[%s5219_s1 + $0x458] sm:$0xff]  }
  0x2e   :  { %3493 = vmatprep.subr.bf16.mxu1 %v3976_v63  ;;  %v4028_v63 = vld [vmem:[%s5219_s1 + $0x3c0] sm:$0xff]  }
  0x30   :  { %3472 = vmatpush3.bf16.msra.mxu0 %v3977_v0  ;;  %v648_v0 = vrot.slane %v620_v57, %v4364_v41  ;;  %v4081_v57 = vld [vmem:[%s5219_s1 + $0x4e8] sm:$0xff]  }
  0x31   :  { %3473 = vmatprep.subr.bf16.mxu0 %v3979_v2  ;;  %3494 = vmatpush3.bf16.msra.mxu1 %v3978_v1  ;;  %v4029_v1 = vld [vmem:[%s5219_s1 + $0x300] sm:$0xff]  }
  0x32   :  { %3495 = vmatprep.subr.bf16.mxu1 %v3980_v3  ;;  %v4030_v2 = vld [vmem:[%s5219_s1 + $0x380] sm:$0xff]   ;;  %v649_v3 = vcombine.high %v627_v61, %v627_v61 }
  0x34   :  { %3474 = vmatpush3.bf16.msra.mxu0 %v3981_v4  ;;  %v4031_v4 = vld [vmem:[%s5219_s1 + $0x348] sm:$0xff]  }
  0x35   :  { %3475 = vmatprep.subr.bf16.mxu0 %v3983_v6  ;;  %3496 = vmatpush3.bf16.msra.mxu1 %v3982_v5  ;;  %v4032_v5 = vld [vmem:[%s5219_s1 + $0x3c8] sm:$0xff]   ;;  %v652_v6 = vcombine.high %v648_v0, %v648_v0 }
  0x36   :  { %3497 = vmatprep.subr.bf16.mxu1 %v3984_v7  ;;  %v4033_v7 = vld [vmem:[%s5219_s1 + $0x308] sm:$0xff]  }
  0x38   :  { %3476 = vmatpush3.bf16.msra.mxu0 %v3985_v8  ;;  %v4034_v8 = vld [vmem:[%s5219_s1 + $0x388] sm:$0xff]  }
  0x39   :  { %3477 = vmatprep.subr.bf16.mxu0 %v3987_v10  ;;  %3498 = vmatpush3.bf16.msra.mxu1 %v3986_v9  ;;  %v4035_v9 = vld [vmem:[%s5219_s1 + $0x350] sm:$0xff]  }
  0x3a   :  { %3499 = vmatprep.subr.bf16.mxu1 %v3988_v11  ;;  %v4036_v10 = vld [vmem:[%s5219_s1 + $0x3d0] sm:$0xff]  }
  0x3b   :  { %v4037_v11 = vld [vmem:[%s5219_s1 + $0x310] sm:$0xff]  }
  0x3c   :  { %3478 = vmatpush3.bf16.msra.mxu0 %v3989_v12  ;;  %v4038_v12 = vld [vmem:[%s5219_s1 + $0x390] sm:$0xff]  }
  0x3d   :  { %3479 = vmatprep.subr.bf16.mxu0 %v3991_v14  ;;  %3500 = vmatpush3.bf16.msra.mxu1 %v3990_v13  ;;  %v4039_v13 = vld [vmem:[%s5219_s1 + $0x358] sm:$0xff]  }
  0x3e   :  { %3501 = vmatprep.subr.bf16.mxu1 %v3992_v15  ;;  %v4040_v14 = vld [vmem:[%s5219_s1 + $0x3d8] sm:$0xff]  }
  0x3f   :  { %v4041_v15 = vld [vmem:[%s5219_s1 + $0x318] sm:$0xff]  }
  0x40   :  { %3480 = vmatpush3.bf16.msra.mxu0 %v3993_v16  ;;  %v4042_v16 = vld [vmem:[%s5219_s1 + $0x398] sm:$0xff]  }
  0x41   :  { %3509 = vmatprep.subr.bf16.mxu0 %v3995_v19  ;;  %3502 = vmatpush3.bf16.msra.mxu1 %v3994_v17  ;;  %v4043_v17 = vld [vmem:[%s5219_s1 + $0x360] sm:$0xff]  }
  0x42   :  { %3531 = vmatprep.subr.bf16.mxu1 %v3996_v20  ;;  %v4045_v19 = vld [vmem:[%s5219_s1 + $0x320] sm:$0xff]  }
  0x43   :  { %2432 = vmatmul.mubr.bf16.vlgmr.msra.gmra.mrb[4].mxu0 %v585_v18  ;;  %v4044_v18 = vld [vmem:[%s5219_s1 + $0x3e0] sm:$0xff]  }
  0x44   :  { %3510 = vmatpush3.bf16.msra.mxu0 %v3997_v21  ;;  %2472 = vmatmul.mubr.bf16.vlgmr.msra.gmra.mrb[4].mxu1 %v601_v23  ;;  %v4046_v20 = vld [vmem:[%s5219_s1 + $0x3a0] sm:$0xff]   ;;  %v4047_v21 = vld [vmem:[%s5219_s1 + $0x368] sm:$0xff]  }
  0x45   :  { %3511 = vmatprep.subr.bf16.mxu0 %v3999_v24  ;;  %3532 = vmatpush3.bf16.msra.mxu1 %v3998_v22  ;;  %v4048_v22 = vld [vmem:[%s5219_s1 + $0x3e8] sm:$0xff]  }
  0x46   :  { %3533 = vmatprep.subr.bf16.mxu1 %v4000_v25  ;;  %2511 = vmatprep.mubr.bf16.mxu0 %v641_v56  ;;  %v4049_v23 = vld [vmem:[%s5219_s1 + $0x328] sm:$0xff]   ;;  %v4051_v25 = vld [vmem:[%s5219_s1 + $0x370] sm:$0xff]  }
  0x47   :  { %2551 = vmatprep.mubr.bf16.mxu1 %v651_v60  ;;  %v4050_v24 = vld [vmem:[%s5219_s1 + $0x3a8] sm:$0xff]   ;;  %v4084_v60 = vld [vmem:[%s5219_s1 + $0x470] sm:$0xff]  }
  0x48   :  { %3512 = vmatpush3.bf16.msra.mxu0 %v4001_v26  ;;  %v4052_v26 = vld [vmem:[%s5219_s1 + $0x3f0] sm:$0xff]   ;;  %v4080_v56 = vld [vmem:[%s5219_s1 + $0x468] sm:$0xff]  }
  0x49   :  { %3513 = vmatprep.subr.bf16.mxu0 %v4003_v28  ;;  %3534 = vmatpush3.bf16.msra.mxu1 %v4002_v27  ;;  %v4053_v27 = vld [vmem:[%s5219_s1 + $0x330] sm:$0xff]  }
  0x4a   :  { %3535 = vmatprep.subr.bf16.mxu1 %v4004_v29  ;;  %v4054_v28 = vld [vmem:[%s5219_s1 + $0x3b0] sm:$0xff]   ;;  %v4055_v29 = vld [vmem:[%s5219_s1 + $0x378] sm:$0xff]  }
  0x4c   :  { %3514 = vmatpush3.bf16.msra.mxu0 %v4005_v30  ;;  %v4056_v30 = vld [vmem:[%s5219_s1 + $0x3f8] sm:$0xff]  }
  0x4d   :  { %3515 = vmatprep.subr.bf16.mxu0 %v4007_v32  ;;  %3536 = vmatpush3.bf16.msra.mxu1 %v4006_v31  ;;  %v4057_v31 = vld [vmem:[%s5219_s1 + $0x338] sm:$0xff]  }
  0x4e   :  { %3537 = vmatprep.subr.bf16.mxu1 %v4008_v33  ;;  %v4058_v32 = vld [vmem:[%s5219_s1 + $0x3b8] sm:$0xff]   ;;  %v634_v33 = vrot.slane %v4556_v53, %v4364_v41  ;;  %v4077_v53 = vld [vmem:[%s5219_s1 + $0x4e0] sm:$0xff]  }
  0x50   :  { %3516 = vmatpush3.bf16.msra.mxu0 %v4009_v34  ;;  %v4060_v34 = vld [vmem:[%s5219_s1 + $0x440] sm:$0xff]  }
  0x51   :  { %3517 = vmatprep.subr.bf16.mxu0 %v4011_v36  ;;  %3538 = vmatpush3.bf16.msra.mxu1 %v4010_v35  ;;  %v4061_v35 = vld [vmem:[%s5219_s1 + $0x4c0] sm:$0xff]  }
  0x52   :  { %3539 = vmatprep.subr.bf16.mxu1 %v4012_v37  ;;  %v4062_v36 = vld [vmem:[%s5219_s1 + $0x400] sm:$0xff]  }
  0x53   :  { %v4063_v37 = vld [vmem:[%s5219_s1 + $0x480] sm:$0xff]  }
  0x54   :  { %3518 = vmatpush3.bf16.msra.mxu0 %v4013_v38  ;;  %v650_v38 = vcombine.high %v634_v33, %v634_v33 }
  0x55   :  { %3519 = vmatprep.subr.bf16.mxu0 %v4015_v40  ;;  %3540 = vmatpush3.bf16.msra.mxu1 %v4014_v39  ;;  %v4064_v39 = vld [vmem:[%s5219_s1 + $0x448] sm:$0xff]  }
  0x56   :  { %3541 = vmatprep.subr.bf16.mxu1 %v4016_v42  ;;  %v4065_v40 = vld [vmem:[%s5219_s1 + $0x4c8] sm:$0xff]  }
  0x57   :  { %v4066_v42 = vld [vmem:[%s5219_s1 + $0x408] sm:$0xff]  }
  0x58   :  { %3520 = vmatpush3.bf16.msra.mxu0 %v4017_v43  ;;  %v4067_v43 = vld [vmem:[%s5219_s1 + $0x488] sm:$0xff]  }
  0x59   :  { %3521 = vmatprep.subr.bf16.mxu0 %v4019_v45  ;;  %3542 = vmatpush3.bf16.msra.mxu1 %v4018_v44  ;;  %v4068_v44 = vld [vmem:[%s5219_s1 + $0x450] sm:$0xff]  }
  0x5a   :  { %3543 = vmatprep.subr.bf16.mxu1 %v4020_v47  ;;  %v4069_v45 = vld [vmem:[%s5219_s1 + $0x4d0] sm:$0xff]  }
  0x5b   :  { %v4071_v47 = vld [vmem:[%s5219_s1 + $0x490] sm:$0xff]  }
  0x5c   :  { %3522 = vmatpush3.bf16.msra.mxu0 %v4021_v50  ;;  %v4074_v50 = vld [vmem:[%s5219_s1 + $0x418] sm:$0xff]  }
  0x5d   :  { %3523 = vmatprep.subr.bf16.mxu0 %v4023_v54  ;;  %3544 = vmatpush3.bf16.msra.mxu1 %v4022_v51  ;;  %v4075_v51 = vld [vmem:[%s5219_s1 + $0x498] sm:$0xff]   ;;  %v4078_v54 = vld [vmem:[%s5219_s1 + $0x420] sm:$0xff]  }
  0x5e   :  { %3545 = vmatprep.subr.bf16.mxu1 %v4024_v55  ;;  %v4079_v55 = vld [vmem:[%s5219_s1 + $0x4a0] sm:$0xff]  }
  0x60   :  { %3524 = vmatpush3.bf16.msra.mxu0 %v4025_v58  ;;  %v4082_v58 = vld [vmem:[%s5219_s1 + $0x428] sm:$0xff]  }
  0x61   :  { %3553 = vmatprep.subr.bf16.mxu0 %v4027_v62  ;;  %3546 = vmatpush3.bf16.msra.mxu1 %v4026_v59  ;;  %v4083_v59 = vld [vmem:[%s5219_s1 + $0x4a8] sm:$0xff]   ;;  %v4085_v62 = vld [vmem:[%s5219_s1 + $0x4f0] sm:$0xff]  }
  0x62   :  { %3575 = vmatprep.subr.bf16.mxu1 %v4028_v63 }
  0x63   :  { %2512 = vmatmul.mubr.bf16.vlgmr.msra.gmra.mrb[8].mxu0 %v627_v61  ;;  %v30_v61 = vld [vmem:[%s5218_s0 + $0x10] sm:$0xff] }
  0x64   :  { %3554 = vmatpush3.bf16.msra.mxu0 %v4029_v1  ;;  %2591 = vmatprep.mubr.bf16.mxu0 %v648_v0  ;;  %v660_v63 = vrot.slane %v30_v61, %v4364_v41  ;;  %v653_v0 = vcombine.high %v30_v61, %v30_v61  ;;  %v4086_v1 = vld [vmem:[%s5219_s1 + $0x430] sm:$0xff]  }
  0x65   :  { %2552 = vmatmul.mubr.bf16.vlgmr.msra.gmra.mrb[8].mxu1 %v649_v3  ;;  %3555 = vmatprep.subr.bf16.mxu0 %v4031_v4  ;;  %v4135_v61 = vld [vmem:[%s5219_s1 + $0x610] sm:$0xff]  }
  0x66   :  { %3576 = vmatpush3.bf16.msra.mxu1 %v4030_v2  ;;  %2631 = vmatprep.mubr.bf16.mxu1 %v652_v6  ;;  %v4087_v2 = vld [vmem:[%s5219_s1 + $0x4b0] sm:$0xff]   ;;  %v668_v3 = vcombine.high %v660_v63, %v660_v63  ;;  %v4762_v4 = vrot.slane %v653_v0, %v4364_v41  ;;  %v4089_v6 = vld [vmem:[%s5219_s1 + $0x4f8] sm:$0xff]  }
  0x67   :  { %3577 = vmatprep.subr.bf16.mxu1 %v4032_v5  ;;  %v4088_v5 = vld [vmem:[%s5219_s1 + $0x478] sm:$0xff]  }
  0x68   :  { %3556 = vmatpush3.bf16.msra.mxu0 %v4033_v7  ;;  %v690_v7 = vrot.slane %v668_v3, %v4364_v41  ;;  %v4138_v0 = vld [vmem:[%s5219_s1 + $0x6d8] sm:$0xff]   ;;  %v4141_v3 = vld [vmem:[%s5219_s1 + $0x660] sm:$0xff]  }
  0x69   :  { %3557 = vmatprep.subr.bf16.mxu0 %v4035_v9  ;;  %v4090_v9 = vld [vmem:[%s5219_s1 + $0x438] sm:$0xff]  }
  0x6a   :  { %3578 = vmatpush3.bf16.msra.mxu1 %v4034_v8  ;;  %v669_v8 = vcombine.high %v4762_v4, %v4762_v4 }
  0x6b   :  { %3579 = vmatprep.subr.bf16.mxu1 %v4036_v10  ;;  %v4091_v10 = vld [vmem:[%s5219_s1 + $0x4b8] sm:$0xff]  }
  0x6c   :  { %3558 = vmatpush3.bf16.msra.mxu0 %v4037_v11  ;;  %v700_v11 = vcombine.high %v690_v7, %v690_v7 }
  0x6d   :  { %3559 = vmatprep.subr.bf16.mxu0 %v4039_v13  ;;  %v4092_v13 = vld [vmem:[%s5219_s1 + $0x540] sm:$0xff]  }
  0x6e   :  { %3580 = vmatpush3.bf16.msra.mxu1 %v4038_v12  ;;  %v676_v12 = vrot.slane %v660_v63, %v4364_v41  ;;  %v4137_v63 = vld [vmem:[%s5219_s1 + $0x658] sm:$0xff]  }
  0x6f   :  { %3581 = vmatprep.subr.bf16.mxu1 %v4040_v14  ;;  %v4093_v14 = vld [vmem:[%s5219_s1 + $0x5c0] sm:$0xff]  }
  0x70   :  { %3560 = vmatpush3.bf16.msra.mxu0 %v4041_v15  ;;  %v697_v15 = vrot.slane %v669_v8, %v4364_v41  ;;  %v4146_v8 = vld [vmem:[%s5219_s1 + $0x6e8] sm:$0xff]  }
  0x71   :  { %3561 = vmatprep.subr.bf16.mxu0 %v4043_v17  ;;  %v4095_v17 = vld [vmem:[%s5219_s1 + $0x580] sm:$0xff]  }
  0x72   :  { %3582 = vmatpush3.bf16.msra.mxu1 %v4042_v16  ;;  %v4094_v16 = vld [vmem:[%s5219_s1 + $0x500] sm:$0xff]  }
  0x73   :  { %3583 = vmatprep.subr.bf16.mxu1 %v4044_v18  ;;  %v698_v18 = vcombine.high %v676_v12, %v676_v12 }
  0x74   :  { %3562 = vmatpush3.bf16.msra.mxu0 %v4045_v19  ;;  %v4096_v19 = vld [vmem:[%s5219_s1 + $0x548] sm:$0xff]  }
  0x75   :  { %3563 = vmatprep.subr.bf16.mxu0 %v4047_v21  ;;  %v701_v21 = vcombine.high %v697_v15, %v697_v15 }
  0x76   :  { %3584 = vmatpush3.bf16.msra.mxu1 %v4046_v20  ;;  %v4097_v20 = vld [vmem:[%s5219_s1 + $0x5c8] sm:$0xff]  }
  0x77   :  { %3585 = vmatprep.subr.bf16.mxu1 %v4048_v22  ;;  %v4098_v22 = vld [vmem:[%s5219_s1 + $0x508] sm:$0xff]  }
  0x78   :  { %3564 = vmatpush3.bf16.msra.mxu0 %v4049_v23  ;;  %v4099_v23 = vld [vmem:[%s5219_s1 + $0x588] sm:$0xff]  }
  0x79   :  { %3565 = vmatprep.subr.bf16.mxu0 %v4051_v25  ;;  %v4101_v25 = vld [vmem:[%s5219_s1 + $0x5d0] sm:$0xff]  }
  0x7a   :  { %3586 = vmatpush3.bf16.msra.mxu1 %v4050_v24  ;;  %v4100_v24 = vld [vmem:[%s5219_s1 + $0x550] sm:$0xff]  }
  0x7b   :  { %3587 = vmatprep.subr.bf16.mxu1 %v4052_v26  ;;  %v4102_v26 = vld [vmem:[%s5219_s1 + $0x510] sm:$0xff]  }
  0x7c   :  { %3566 = vmatpush3.bf16.msra.mxu0 %v4053_v27  ;;  %v4103_v27 = vld [vmem:[%s5219_s1 + $0x590] sm:$0xff]  }
  0x7d   :  { %3567 = vmatprep.subr.bf16.mxu0 %v4055_v29  ;;  %v4105_v29 = vld [vmem:[%s5219_s1 + $0x5d8] sm:$0xff]  }
  0x7e   :  { %3588 = vmatpush3.bf16.msra.mxu1 %v4054_v28  ;;  %v4104_v28 = vld [vmem:[%s5219_s1 + $0x558] sm:$0xff]  }
  0x7f   :  { %3589 = vmatprep.subr.bf16.mxu1 %v4056_v30  ;;  %v4106_v30 = vld [vmem:[%s5219_s1 + $0x518] sm:$0xff]  }
  0x80   :  { %3568 = vmatpush3.bf16.msra.mxu0 %v4057_v31  ;;  %v4107_v31 = vld [vmem:[%s5219_s1 + $0x598] sm:$0xff]  }
  0x81   :  { %3597 = vmatprep.subr.bf16.mxu0 %v4060_v34  ;;  %v4110_v34 = vld [vmem:[%s5219_s1 + $0x520] sm:$0xff]  }
  0x82   :  { %3590 = vmatpush3.bf16.msra.mxu1 %v4058_v32  ;;  %v4108_v32 = vld [vmem:[%s5219_s1 + $0x560] sm:$0xff]  }
  0x83   :  { %2592 = vmatmul.mubr.bf16.vlgmr.msra.gmra.mrb[12].mxu0 %v634_v33  ;;  %3619 = vmatprep.subr.bf16.mxu1 %v4061_v35  ;;  %v4109_v33 = vld [vmem:[%s5219_s1 + $0x5e0] sm:$0xff]  }
  0x84   :  { %3598 = vmatpush3.bf16.msra.mxu0 %v4062_v36  ;;  %2671 = vmatprep.mubr.bf16.mxu0 %v690_v7  ;;  %v4111_v35 = vld [vmem:[%s5219_s1 + $0x5a0] sm:$0xff]   ;;  %v4112_v36 = vld [vmem:[%s5219_s1 + $0x568] sm:$0xff]  }
  0x85   :  { %2632 = vmatmul.mubr.bf16.vlgmr.msra.gmra.mrb[12].mxu1 %v650_v38  ;;  %3599 = vmatprep.subr.bf16.mxu0 %v4064_v39  ;;  %v4114_v38 = vld [vmem:[%s5219_s1 + $0x528] sm:$0xff]  }
  0x86   :  { %3620 = vmatpush3.bf16.msra.mxu1 %v4063_v37  ;;  %2711 = vmatprep.mubr.bf16.mxu1 %v700_v11  ;;  %v4113_v37 = vld [vmem:[%s5219_s1 + $0x5e8] sm:$0xff]   ;;  %v4149_v11 = vld [vmem:[%s5219_s1 + $0x670] sm:$0xff]  }
  0x87   :  { %3621 = vmatprep.subr.bf16.mxu1 %v4065_v40  ;;  %v4115_v39 = vld [vmem:[%s5219_s1 + $0x5a8] sm:$0xff]   ;;  %v4116_v40 = vld [vmem:[%s5219_s1 + $0x570] sm:$0xff]  }
  0x88   :  { %3600 = vmatpush3.bf16.msra.mxu0 %v4066_v42  ;;  %v4117_v42 = vld [vmem:[%s5219_s1 + $0x5f0] sm:$0xff]   ;;  %v4145_v7 = vld [vmem:[%s5219_s1 + $0x668] sm:$0xff]  }
  0x89   :  { %3601 = vmatprep.subr.bf16.mxu0 %v4068_v44  ;;  %v4119_v44 = vld [vmem:[%s5219_s1 + $0x5b0] sm:$0xff]  }
  0x8a   :  { %3622 = vmatpush3.bf16.msra.mxu1 %v4067_v43  ;;  %v4118_v43 = vld [vmem:[%s5219_s1 + $0x530] sm:$0xff]  }
  0x8b   :  { %3623 = vmatprep.subr.bf16.mxu1 %v4069_v45  ;;  %v4120_v45 = vld [vmem:[%s5219_s1 + $0x578] sm:$0xff]  }
  0x8c   :  { %3602 = vmatpush3.bf16.msra.mxu0 %v4070_v46  ;;  %v4121_v46 = vld [vmem:[%s5219_s1 + $0x5f8] sm:$0xff]  }
  0x8d   :  { %3603 = vmatprep.subr.bf16.mxu0 %v4072_v48  ;;  %v4123_v48 = vld [vmem:[%s5219_s1 + $0x5b8] sm:$0xff]  }
  0x8e   :  { %3624 = vmatpush3.bf16.msra.mxu1 %v4071_v47  ;;  %v4122_v47 = vld [vmem:[%s5219_s1 + $0x538] sm:$0xff]  }
  0x8f   :  { %3625 = vmatprep.subr.bf16.mxu1 %v4073_v49  ;;  %v683_v49 = vrot.slane %v4762_v4, %v4364_v41  ;;  %v4142_v4 = vld [vmem:[%s5219_s1 + $0x6e0] sm:$0xff]  }
  0x90   :  { %3604 = vmatpush3.bf16.msra.mxu0 %v4074_v50  ;;  %v4125_v50 = vld [vmem:[%s5219_s1 + $0x640] sm:$0xff]  }
  0x91   :  { %3605 = vmatprep.subr.bf16.mxu0 %v4076_v52  ;;  %v4127_v52 = vld [vmem:[%s5219_s1 + $0x600] sm:$0xff]  }
  0x92   :  { %3626 = vmatpush3.bf16.msra.mxu1 %v4075_v51  ;;  %v4126_v51 = vld [vmem:[%s5219_s1 + $0x6c0] sm:$0xff]  }
  0x93   :  { %3627 = vmatprep.subr.bf16.mxu1 %v4077_v53  ;;  %v4128_v53 = vld [vmem:[%s5219_s1 + $0x680] sm:$0xff]  }
  0x94   :  { %3606 = vmatpush3.bf16.msra.mxu0 %v4078_v54  ;;  %v699_v54 = vcombine.high %v683_v49, %v683_v49 }
  0x95   :  { %3607 = vmatprep.subr.bf16.mxu0 %v4080_v56  ;;  %v4130_v56 = vld [vmem:[%s5219_s1 + $0x6c8] sm:$0xff]  }
  0x96   :  { %3628 = vmatpush3.bf16.msra.mxu1 %v4079_v55  ;;  %v4129_v55 = vld [vmem:[%s5219_s1 + $0x648] sm:$0xff]  }
  0x97   :  { %3629 = vmatprep.subr.bf16.mxu1 %v4081_v57  ;;  %v4131_v57 = vld [vmem:[%s5219_s1 + $0x608] sm:$0xff]  }
  0x98   :  { %3608 = vmatpush3.bf16.msra.mxu0 %v4082_v58  ;;  %v4132_v58 = vld [vmem:[%s5219_s1 + $0x688] sm:$0xff]  }
  0x99   :  { %3609 = vmatprep.subr.bf16.mxu0 %v4084_v60  ;;  %v4134_v60 = vld [vmem:[%s5219_s1 + $0x6d0] sm:$0xff]  }
  0x9a   :  { %3630 = vmatpush3.bf16.msra.mxu1 %v4083_v59  ;;  %v4133_v59 = vld [vmem:[%s5219_s1 + $0x650] sm:$0xff]  }
  0x9b   :  { %3631 = vmatprep.subr.bf16.mxu1 %v4085_v62  ;;  %v4136_v62 = vld [vmem:[%s5219_s1 + $0x690] sm:$0xff]  }
  0x9c   :  { %3610 = vmatpush3.bf16.msra.mxu0 %v4086_v1  ;;  %v4139_v1 = vld [vmem:[%s5219_s1 + $0x618] sm:$0xff]  }
  0x9d   :  { %3611 = vmatprep.subr.bf16.mxu0 %v4088_v5  ;;  %v4143_v5 = vld [vmem:[%s5219_s1 + $0x620] sm:$0xff]  }
  0x9e   :  { %3632 = vmatpush3.bf16.msra.mxu1 %v4087_v2  ;;  %v4140_v2 = vld [vmem:[%s5219_s1 + $0x698] sm:$0xff]  }
  0x9f   :  { %3633 = vmatprep.subr.bf16.mxu1 %v4089_v6  ;;  %v4144_v6 = vld [vmem:[%s5219_s1 + $0x6a0] sm:$0xff]  }
  0xa0   :  { %3612 = vmatpush3.bf16.msra.mxu0 %v4090_v9  ;;  %v4147_v9 = vld [vmem:[%s5219_s1 + $0x628] sm:$0xff]  }
  0xa1   :  { %3641 = vmatprep.subr.bf16.mxu0 %v4092_v13  ;;  %v4150_v13 = vld [vmem:[%s5219_s1 + $0x6f0] sm:$0xff]  }
  0xa2   :  { %3634 = vmatpush3.bf16.msra.mxu1 %v4091_v10  ;;  %v4148_v10 = vld [vmem:[%s5219_s1 + $0x6a8] sm:$0xff]  }
  0xa3   :  { %2672 = vmatmul.mubr.bf16.vlgmr.msra.gmra.mrb[16].mxu0 %v676_v12  ;;  %3663 = vmatprep.subr.bf16.mxu1 %v4093_v14  ;;  %v31_v12 = vld [vmem:[%s5218_s0 + $0x18] sm:$0xff] }
  0xa4   :  { %3642 = vmatpush3.bf16.msra.mxu0 %v4094_v16  ;;  %2751 = vmatprep.mubr.bf16.mxu0 %v697_v15  ;;  %v709_v14 = vrot.slane %v31_v12, %v4364_v41  ;;  %v702_v15 = vcombine.high %v31_v12, %v31_v12  ;;  %v4151_v16 = vld [vmem:[%s5219_s1 + $0x630] sm:$0xff]  }
  0xa5   :  { %2712 = vmatmul.mubr.bf16.vlgmr.msra.gmra.mrb[16].mxu1 %v698_v18  ;;  %3643 = vmatprep.subr.bf16.mxu0 %v4096_v19 }
  0xa6   :  { %3664 = vmatpush3.bf16.msra.mxu1 %v4095_v17  ;;  %2791 = vmatprep.mubr.bf16.mxu1 %v701_v21  ;;  %v4153_v17 = vld [vmem:[%s5219_s1 + $0x678] sm:$0xff]   ;;  %v717_v18 = vcombine.high %v709_v14, %v709_v14  ;;  %v4968_v19 = vrot.slane %v702_v15, %v4364_v41 }
  0xa7   :  { %3665 = vmatprep.subr.bf16.mxu1 %v4097_v20  ;;  %v4152_v20 = vld [vmem:[%s5219_s1 + $0x6b0] sm:$0xff]   ;;  %v4154_v21 = vld [vmem:[%s5219_s1 + $0x6f8] sm:$0xff]  }
  0xa8   :  { %3644 = vmatpush3.bf16.msra.mxu0 %v4098_v22  ;;  %v739_v22 = vrot.slane %v717_v18, %v4364_v41 }
  0xa9   :  { %3645 = vmatprep.subr.bf16.mxu0 %v4100_v24  ;;  %v4155_v24 = vld [vmem:[%s5219_s1 + $0x638] sm:$0xff]  }
  0xaa   :  { %3666 = vmatpush3.bf16.msra.mxu1 %v4099_v23  ;;  %v718_v23 = vcombine.high %v4968_v19, %v4968_v19 }
  0xab   :  { %3667 = vmatprep.subr.bf16.mxu1 %v4101_v25  ;;  %v749_v25 = vcombine.high %v739_v22, %v739_v22 }
  0xac   :  { %3646 = vmatpush3.bf16.msra.mxu0 %v4102_v26  ;;  %v725_v26 = vrot.slane %v709_v14, %v4364_v41 }
  0xad   :  { %3647 = vmatprep.subr.bf16.mxu0 %v4104_v28  ;;  %v4156_v28 = vld [vmem:[%s5219_s1 + $0x6b8] sm:$0xff]  }
  0xae   :  { %3668 = vmatpush3.bf16.msra.mxu1 %v4103_v27  ;;  %v4157_v27 = vld [vmem:[%s5219_s1 + $0x740] sm:$0xff]  }
  0xaf   :  { %3669 = vmatprep.subr.bf16.mxu1 %v4105_v29  ;;  %v746_v29 = vrot.slane %v718_v23, %v4364_v41 }
  0xb0   :  { %3648 = vmatpush3.bf16.msra.mxu0 %v4106_v30  ;;  %v4158_v30 = vld [vmem:[%s5219_s1 + $0x7c0] sm:$0xff]  }
  0xb1   :  { %3649 = vmatprep.subr.bf16.mxu0 %v4108_v32  ;;  %v747_v32 = vcombine.high %v725_v26, %v725_v26 }
  0xb2   :  { %3670 = vmatpush3.bf16.msra.mxu1 %v4107_v31  ;;  %v4159_v31 = vld [vmem:[%s5219_s1 + $0x700] sm:$0xff]  }
  0xb3   :  { %3671 = vmatprep.subr.bf16.mxu1 %v4109_v33  ;;  %v4161_v33 = vld [vmem:[%s5219_s1 + $0x748] sm:$0xff]  }
  0xb4   :  { %3650 = vmatpush3.bf16.msra.mxu0 %v4110_v34  ;;  %v4160_v34 = vld [vmem:[%s5219_s1 + $0x780] sm:$0xff]  }
  0xb5   :  { %3651 = vmatprep.subr.bf16.mxu0 %v4112_v36  ;;  %v4162_v36 = vld [vmem:[%s5219_s1 + $0x7c8] sm:$0xff]  }
  0xb6   :  { %3672 = vmatpush3.bf16.msra.mxu1 %v4111_v35  ;;  %v750_v35 = vcombine.high %v746_v29, %v746_v29 }
  0xb7   :  { %3673 = vmatprep.subr.bf16.mxu1 %v4113_v37  ;;  %v4163_v37 = vld [vmem:[%s5219_s1 + $0x708] sm:$0xff]  }
  0xb8   :  { %3652 = vmatpush3.bf16.msra.mxu0 %v4114_v38  ;;  %v4165_v38 = vld [vmem:[%s5219_s1 + $0x750] sm:$0xff]  }
  0xb9   :  { %3653 = vmatprep.subr.bf16.mxu0 %v4116_v40  ;;  %v4166_v40 = vld [vmem:[%s5219_s1 + $0x7d0] sm:$0xff]  }
  0xba   :  { %3674 = vmatpush3.bf16.msra.mxu1 %v4115_v39  ;;  %v4164_v39 = vld [vmem:[%s5219_s1 + $0x788] sm:$0xff]  }
  0xbb   :  { %3675 = vmatprep.subr.bf16.mxu1 %v4117_v42  ;;  %v4167_v42 = vld [vmem:[%s5219_s1 + $0x710] sm:$0xff]  }
  0xbc   :  { %3654 = vmatpush3.bf16.msra.mxu0 %v4118_v43  ;;  %v4169_v43 = vld [vmem:[%s5219_s1 + $0x758] sm:$0xff]  }
  0xbd   :  { %3655 = vmatprep.subr.bf16.mxu0 %v4120_v45  ;;  %v4170_v45 = vld [vmem:[%s5219_s1 + $0x7d8] sm:$0xff]  }
  0xbe   :  { %3676 = vmatpush3.bf16.msra.mxu1 %v4119_v44  ;;  %v4168_v44 = vld [vmem:[%s5219_s1 + $0x790] sm:$0xff]  }
  0xbf   :  { %3677 = vmatprep.subr.bf16.mxu1 %v4121_v46  ;;  %v4171_v46 = vld [vmem:[%s5219_s1 + $0x718] sm:$0xff]  }
  0xc0   :  { %3656 = vmatpush3.bf16.msra.mxu0 %v4122_v47  ;;  %v4173_v47 = vld [vmem:[%s5219_s1 + $0x760] sm:$0xff]  }
  0xc1   :  { %3685 = vmatprep.subr.bf16.mxu0 %v4125_v50  ;;  %v4175_v50 = vld [vmem:[%s5219_s1 + $0x720] sm:$0xff]  }
  0xc2   :  { %3678 = vmatpush3.bf16.msra.mxu1 %v4123_v48  ;;  %v4172_v48 = vld [vmem:[%s5219_s1 + $0x798] sm:$0xff]  }
  0xc3   :  { %2752 = vmatmul.mubr.bf16.vlgmr.msra.gmra.mrb[20].mxu0 %v683_v49  ;;  %3707 = vmatprep.subr.bf16.mxu1 %v4126_v51  ;;  %v4174_v49 = vld [vmem:[%s5219_s1 + $0x7e0] sm:$0xff]   ;;  %v4177_v51 = vld [vmem:[%s5219_s1 + $0x768] sm:$0xff]  }
  0xc4   :  { %3686 = vmatpush3.bf16.msra.mxu0 %v4127_v52  ;;  %2831 = vmatprep.mubr.bf16.mxu0 %v739_v22  ;;  %v4176_v52 = vld [vmem:[%s5219_s1 + $0x7a0] sm:$0xff]  }
  0xc5   :  { %2792 = vmatmul.mubr.bf16.vlgmr.msra.gmra.mrb[20].mxu1 %v699_v54  ;;  %3687 = vmatprep.subr.bf16.mxu0 %v4129_v55  ;;  %v4179_v54 = vld [vmem:[%s5219_s1 + $0x728] sm:$0xff]   ;;  %v4181_v55 = vld [vmem:[%s5219_s1 + $0x770] sm:$0xff]  }
  0xc6   :  { %3708 = vmatpush3.bf16.msra.mxu1 %v4128_v53  ;;  %2871 = vmatprep.mubr.bf16.mxu1 %v749_v25  ;;  %v4178_v53 = vld [vmem:[%s5219_s1 + $0x7e8] sm:$0xff]  }
  0xc7   :  { %3709 = vmatprep.subr.bf16.mxu1 %v4130_v56 }
  0xc8   :  { %3688 = vmatpush3.bf16.msra.mxu0 %v4131_v57  ;;  %v4180_v57 = vld [vmem:[%s5219_s1 + $0x7a8] sm:$0xff]  }
  0xc9   :  { %3689 = vmatprep.subr.bf16.mxu0 %v4133_v59 }
  0xca   :  { %3710 = vmatpush3.bf16.msra.mxu1 %v4132_v58 }
  0xcb   :  { %3711 = vmatprep.subr.bf16.mxu1 %v4134_v60 }
  0xcc   :  { %3690 = vmatpush3.bf16.msra.mxu0 %v4135_v61 }
  0xcd   :  { %3691 = vmatprep.subr.bf16.mxu0 %v4137_v63 }
  0xce   :  { %3712 = vmatpush3.bf16.msra.mxu1 %v4136_v62 }
  0xcf   :  { %3713 = vmatprep.subr.bf16.mxu1 %v4138_v0 }
  0xd0   :  { %3692 = vmatpush3.bf16.msra.mxu0 %v4139_v1 }
  0xd1   :  { %3693 = vmatprep.subr.bf16.mxu0 %v4141_v3 }
  0xd2   :  { %3714 = vmatpush3.bf16.msra.mxu1 %v4140_v2 }
  0xd3   :  { %3715 = vmatprep.subr.bf16.mxu1 %v4142_v4 }
  0xd4   :  { %3694 = vmatpush3.bf16.msra.mxu0 %v4143_v5 }
  0xd5   :  { %3695 = vmatprep.subr.bf16.mxu0 %v4145_v7 }
  0xd6   :  { %3716 = vmatpush3.bf16.msra.mxu1 %v4144_v6 }
  0xd7   :  { %3717 = vmatprep.subr.bf16.mxu1 %v4146_v8 }
  0xd8   :  { %3696 = vmatpush3.bf16.msra.mxu0 %v4147_v9 }
  0xd9   :  { %3697 = vmatprep.subr.bf16.mxu0 %v4149_v11 }
  0xda   :  { %3718 = vmatpush3.bf16.msra.mxu1 %v4148_v10 }
  0xdb   :  { %3719 = vmatprep.subr.bf16.mxu1 %v4150_v13 }
  0xdc   :  { %3698 = vmatpush3.bf16.msra.mxu0 %v4151_v16 }
  0xdd   :  { %3699 = vmatprep.subr.bf16.mxu0 %v4153_v17 }
  0xde   :  { %3720 = vmatpush3.bf16.msra.mxu1 %v4152_v20 }
  0xdf   :  { %3721 = vmatprep.subr.bf16.mxu1 %v4154_v21 }
  0xe0   :  { %3700 = vmatpush3.bf16.msra.mxu0 %v4155_v24 }
  0xe1   :  { %3729 = vmatprep.subr.bf16.mxu0 %v4157_v27 }
  0xe2   :  { %3722 = vmatpush3.bf16.msra.mxu1 %v4156_v28 }
  0xe3   :  { %2832 = vmatmul.mubr.bf16.vlgmr.msra.gmra.mrb[24].mxu0 %v725_v26  ;;  %3751 = vmatprep.subr.bf16.mxu1 %v4158_v30 }
  0xe4   :  { %3730 = vmatpush3.bf16.msra.mxu0 %v4159_v31  ;;  %2911 = vmatprep.mubr.bf16.mxu0 %v746_v29 }
  0xe5   :  { %2872 = vmatmul.mubr.bf16.vlgmr.msra.gmra.mrb[24].mxu1 %v747_v32  ;;  %3731 = vmatprep.subr.bf16.mxu0 %v4161_v33 }
  0xe6   :  { %3752 = vmatpush3.bf16.msra.mxu1 %v4160_v34  ;;  %2951 = vmatprep.mubr.bf16.mxu1 %v750_v35 }
  0xe7   :  { %3753 = vmatprep.subr.bf16.mxu1 %v4162_v36 }
  0xe8   :  { %3732 = vmatpush3.bf16.msra.mxu0 %v4163_v37 }
  0xe9   :  { %3733 = vmatprep.subr.bf16.mxu0 %v4165_v38 }
  0xea   :  { %3754 = vmatpush3.bf16.msra.mxu1 %v4164_v39 }
  0xeb   :  { %3755 = vmatprep.subr.bf16.mxu1 %v4166_v40 }
  0xec   :  { %3734 = vmatpush3.bf16.msra.mxu0 %v4167_v42 }
  0xed   :  { %3735 = vmatprep.subr.bf16.mxu0 %v4169_v43 }
  0xee   :  { %3756 = vmatpush3.bf16.msra.mxu1 %v4168_v44 }
  0xef   :  { %3757 = vmatprep.subr.bf16.mxu1 %v4170_v45 }
  0xf0   :  { %3736 = vmatpush3.bf16.msra.mxu0 %v4171_v46 }
  0xf1   :  { %3737 = vmatprep.subr.bf16.mxu0 %v4173_v47 }
  0xf2   :  { %3758 = vmatpush3.bf16.msra.mxu1 %v4172_v48 }
  0xf3   :  { %3759 = vmatprep.subr.bf16.mxu1 %v4174_v49 }
  0xf4   :  { %3738 = vmatpush3.bf16.msra.mxu0 %v4175_v50 }
  0xf5   :  { %3739 = vmatprep.subr.bf16.mxu0 %v4177_v51 }
  0xf6   :  { %3760 = vmatpush3.bf16.msra.mxu1 %v4176_v52  ;;  %v3437_v56 = vpop.f32.mrb[0].mxu0 }
  0xf7   :  { %12 = vsyncpa [#allocation3], 0  ;;  %v3162_v58 = vld [vmem:[%s5220_s2] ss:$0 sm:$0xff]  ;;  %v3438_v59 = vpop.f32.mrb[1].mxu0  ;;  %3761 = vmatprep.subr.bf16.mxu1 %v4178_v53  ;;  %v4182_v60 = vld [vmem:[%s5219_s1 + $0x7f0] sm:$0xff]   ;;  %v732_v12 = vrot.slane %v4968_v19, %v4364_v41 }
  0xf8   :  { %v3459_v61 = vpop.f32.mrb[0].mxu1  ;;  %v3439_v62 = vadd.f32 %v3438_v59, %v3437_v56  ;;  %v3440_v63 = vpop.f32.mrb[2].mxu0  ;;  %3740 = vmatpush3.bf16.msra.mxu0 %v4179_v54  ;;  %v4183_v0 = vld [vmem:[%s5219_s1 + $0x730] sm:$0xff]   ;;  %v4185_v3 = vld [vmem:[%s5219_s1 + $0x778] sm:$0xff]   ;;  %v2960_v38 = vld [vmem:[%s5221_s3] sm:$0xff]  ;;  %v4215_v42 = vmov 0.0|0.0  }
  0xf9   :  { %v3460_v1 = vpop.f32.mrb[1].mxu1  ;;  %v3441_v2 = vpop.f32.mrb[3].mxu0  ;;  %3741 = vmatprep.subr.bf16.mxu0 %v4181_v55  ;;  %v4184_v7 = vld [vmem:[%s5219_s1 + $0x7b0] sm:$0xff]   ;;  %v4186_v9 = vld [vmem:[%s5219_s1 + $0x7f8] sm:$0xff]   ;;  %v748_v14 = vcombine.high %v732_v12, %v732_v12  ;;  %v2961_v39 = vld [vmem:[%s5221_s3 + $0x8] sm:$0xff]  ;;  %vm4216_vm0 = vmmov 0  }
  0xfa   :  { %v2354_v4 = vadd.f32 %v3439_v62, %v3162_v58  ;;  %v3461_v5 = vadd.f32 %v3460_v1, %v3459_v61  ;;  %v3462_v6 = vpop.f32.mrb[2].mxu1  ;;  %3762 = vmatpush3.bf16.msra.mxu1 %v4180_v57  ;;  %v4187_v11 = vld [vmem:[%s5219_s1 + $0x738] sm:$0xff]   ;;  %v2962_v40 = vld [vmem:[%s5221_s3 + $0x10] sm:$0xff]  ;;  %v3878_v43 = vpack.c.bf16 %v2961_v39, %v2960_v38  ;;  %v2964_v46 = vld [vmem:[%s5221_s3 + $0x20] sm:$0xff]  ;;  %s4218_s25 = smov [#allocation2]  }
  0xfb   :  { %v3463_v8 = vpop.f32.mrb[3].mxu1  ;;  %3763 = vmatprep.subr.bf16.mxu1 %v4182_v60  ;;  %v4188_v13 = vld [vmem:[%s5219_s1 + $0x7b8] sm:$0xff]   ;;  %v2965_v47 = vld [vmem:[%s5221_s3 + $0x28] sm:$0xff]  ;;  %v2966_v49 = vld [vmem:[%s5221_s3 + $0x30] sm:$0xff]  ;;  %s3154_s26 = sshll.u32 %s4218_s25, 4  ;;  %s3155_s26 = int_to_ptr.vmem [resolvable:$true] %s3154_s26 }
  0xfc   :  { %v2394_v10 = vadd.f32 %v3461_v5, %v2354_v4  ;;  %3742 = vmatpush3.bf16.msra.mxu0 %v4183_v0  ;;  %v2963_v44 = vld [vmem:[%s5221_s3 + $0x18] sm:$0xff]  ;;  %v3884_v48 = vpack.c.bf16 %v2965_v47, %v2964_v46  ;;  %v2968_v52 = vld [vmem:[%s5221_s3 + $0x40] sm:$0xff]  ;;  %v2969_v53 = vld [vmem:[%s5221_s3 + $0x48] sm:$0xff]  ;;  %p4195_p1 = scmp.lt.s32.totalorder %s3155_s26, %s3155_s26 }
  0xfd   :  { %3743 = vmatprep.subr.bf16.mxu0 %v4185_v3  ;;  %v3881_v45 = vpack.c.bf16 %v2963_v44, %v2962_v40  ;;  %v2967_v50 = vld [vmem:[%s5221_s3 + $0x38] sm:$0xff]  ;;  %v3890_v54 = vpack.c.bf16 %v2969_v53, %v2968_v52  ;;  %v2970_v55 = vld [vmem:[%s5221_s3 + $0x50] sm:$0xff]  ;;  %v2972_v63 = vld [vmem:[%s5221_s3 + $0x60] sm:$0xff] }
  0xfe   :  { %3764 = vmatpush3.bf16.msra.mxu1 %v4184_v7  ;;  %v3887_v51 = vpack.c.bf16 %v2967_v50, %v2966_v49  ;;  %v2971_v56 = vld [vmem:[%s5221_s3 + $0x58] sm:$0xff]  ;;  %v2973_v0 = vld [vmem:[%s5221_s3 + $0x68] sm:$0xff] }
  0xff   :  { %3765 = vmatprep.subr.bf16.mxu1 %v4186_v9  ;;  %v3893_v57 = vpack.c.bf16 %v2971_v56, %v2970_v55  ;;  %v3896_v3 = vpack.c.bf16 %v2973_v0, %v2972_v63  ;;  %v2974_v9 = vld [vmem:[%s5221_s3 + $0x70] sm:$0xff] }
 0x100   :  { %3744 = vmatpush3.bf16.msra.mxu0 %v4187_v11 }
 0x101   :  { %3877 = vmatprep.subr.bf16.mxu0 %v4215_v42 }
 0x102   :  { %3766 = vmatpush3.bf16.msra.mxu1 %v4188_v13  ;;  %v3054_v13 = vld [vmem:[%s5223_s5] sm:$0xff] }
 0x103   :  { %2912 = vmatmul.mubr.bf16.vlgmr.msra.gmra.mrb[28].mxu0 %v732_v12  ;;  %3901 = vmatprep.subr.bf16.mxu1 %v4215_v42  ;;  %v4217_v12 = vmov 0.0  }
 0x104   :  { %3879 = vmatpush3.bf16.msra.mxu0 %v3878_v43  ;;  %3839 = vmatprep.mubr.msk.f32.mxu0 %vm4216_vm0, %v4217_v12 }
 0x105   :  { %2952 = vmatmul.mubr.bf16.vlgmr.msra.gmra.mrb[28].mxu1 %v748_v14  ;;  %3880 = vmatprep.subr.bf16.mxu0 %v4215_v42  ;;  %v3055_v14 = vld [vmem:[%s5223_s5 + $0x8] sm:$0xff] }
 0x106   :  { %3874 = vmatprep.mubr.msk.f32.mxu1 %vm4216_vm0, %v4217_v12 }
 0x108   :  { %3882 = vmatpush3.bf16.msra.mxu0 %v3881_v45 }
 0x109   :  { %3883 = vmatprep.subr.bf16.mxu0 %v4215_v42 }
 0x10c   :  { %3885 = vmatpush3.bf16.msra.mxu0 %v3884_v48 }
 0x10d   :  { %3886 = vmatprep.subr.bf16.mxu0 %v4215_v42 }
 0x110   :  { %3888 = vmatpush3.bf16.msra.mxu0 %v3887_v51 }
 0x111   :  { %3889 = vmatprep.subr.bf16.mxu0 %v4215_v42 }
 0x114   :  { %3891 = vmatpush3.bf16.msra.mxu0 %v3890_v54 }
 0x115   :  { %3892 = vmatprep.subr.bf16.mxu0 %v4215_v42 }
 0x116   :  { %v3481_v15 = vpop.f32.mrb[4].mxu0 }
 0x117   :  { %v3482_v16 = vpop.f32.mrb[5].mxu0  ;;  %v3503_v17 = vpop.f32.mrb[4].mxu1 }
 0x118   :  { %v3483_v18 = vadd.f32 %v3482_v16, %v3481_v15  ;;  %v3484_v20 = vpop.f32.mrb[6].mxu0  ;;  %v3504_v21 = vpop.f32.mrb[5].mxu1  ;;  %3894 = vmatpush3.bf16.msra.mxu0 %v3893_v57  ;;  %v3056_v15 = vld [vmem:[%s5223_s5 + $0x10] sm:$0xff]  ;;  %v3902_v16 = vpack.c.bf16 %v3055_v14, %v3054_v13 }
 0x119   :  { %v3485_v22 = vpop.f32.mrb[7].mxu0  ;;  %v3505_v41 = vadd.f32 %v3504_v21, %v3503_v17  ;;  %v3506_v19 = vpop.f32.mrb[6].mxu1  ;;  %3895 = vmatprep.subr.bf16.mxu0 %v4215_v42  ;;  %v3057_v17 = vld [vmem:[%s5223_s5 + $0x18] sm:$0xff]  ;;  %v3058_v20 = vld [vmem:[%s5223_s5 + $0x20] sm:$0xff]  ;;  %v3059_v21 = vld [vmem:[%s5223_s5 + $0x28] sm:$0xff] }
 0x11a   :  { %v2434_v23 = vadd.f32 %v3483_v18, %v2394_v10  ;;  %v3507_v24 = vpop.f32.mrb[7].mxu1  ;;  %v2975_v10 = vld [vmem:[%s5221_s3 + $0x78] sm:$0xff]  ;;  %3903 = vmatpush3.bf16.msra.mxu1 %v3902_v16  ;;  %v3905_v18 = vpack.c.bf16 %v3057_v17, %v3056_v15  ;;  %v3908_v22 = vpack.c.bf16 %v3059_v21, %v3058_v20  ;;  %v3068_v20 = vld [vmem:[%s5223_s5 + $0x70] sm:$0xff] }
 0x11b   :  { %v3899_v11 = vpack.c.bf16 %v2975_v10, %v2974_v9  ;;  %3904 = vmatprep.subr.bf16.mxu1 %v4215_v42  ;;  %v3062_v24 = vld [vmem:[%s5223_s5 + $0x40] sm:$0xff]  ;;  %v3069_v21 = vld [vmem:[%s5223_s5 + $0x78] sm:$0xff] }
 0x11c   :  { %v2474_v25 = vadd.f32 %v3505_v41, %v2434_v23  ;;  %3897 = vmatpush3.bf16.msra.mxu0 %v3896_v3  ;;  %v3060_v23 = vld [vmem:[%s5223_s5 + $0x30] sm:$0xff]  ;;  %v3061_v41 = vld [vmem:[%s5223_s5 + $0x38] sm:$0xff] }
 0x11d   :  { %3898 = vmatprep.subr.bf16.mxu0 %v4215_v42  ;;  %v3911_v19 = vpack.c.bf16 %v3061_v41, %v3060_v23  ;;  %v3419_v23 = vld [vmem:[%s5222_s4] ss:$0 sm:$0xff] }
 0x11e   :  { %3906 = vmatpush3.bf16.msra.mxu1 %v3905_v18 }
 0x11f   :  { %3907 = vmatprep.subr.bf16.mxu1 %v4215_v42 }
 0x120   :  { %3900 = vmatpush3.bf16.msra.mxu0 %v3899_v11 }
 0x122   :  { %3909 = vmatpush3.bf16.msra.mxu1 %v3908_v22  ;;  %v3923_v22 = vpack.c.bf16 %v3069_v21, %v3068_v20 }
 0x123   :  { %3910 = vmatprep.subr.bf16.mxu1 %v4215_v42 }
 0x126   :  { %3912 = vmatpush3.bf16.msra.mxu1 %v3911_v19 }
 0x127   :  { %3913 = vmatprep.subr.bf16.mxu1 %v4215_v42 }
 0x136   :  { %v3525_v26 = vpop.f32.mrb[8].mxu0 }
 0x137   :  { %v3526_v27 = vpop.f32.mrb[9].mxu0 }
 0x138   :  { %v3547_v28 = vpop.f32.mrb[8].mxu1  ;;  %v3527_v29 = vadd.f32 %v3526_v27, %v3525_v26  ;;  %v3528_v30 = vpop.f32.mrb[10].mxu0  ;;  %v3064_v27 = vld [vmem:[%s5223_s5 + $0x50] sm:$0xff] }
 0x139   :  { %v3548_v31 = vpop.f32.mrb[9].mxu1  ;;  %v3529_v32 = vpop.f32.mrb[11].mxu0  ;;  %v3066_v30 = vld [vmem:[%s5223_s5 + $0x60] sm:$0xff] }
 0x13a   :  { %v2514_v33 = vadd.f32 %v3527_v29, %v2474_v25  ;;  %v3549_v34 = vadd.f32 %v3548_v31, %v3547_v28  ;;  %v3550_v35 = vpop.f32.mrb[10].mxu1  ;;  %v3063_v25 = vld [vmem:[%s5223_s5 + $0x48] sm:$0xff]  ;;  %v3065_v28 = vld [vmem:[%s5223_s5 + $0x58] sm:$0xff] }
 0x13b   :  { %v3551_v36 = vpop.f32.mrb[11].mxu1  ;;  %v3914_v26 = vpack.c.bf16 %v3063_v25, %v3062_v24  ;;  %v3917_v29 = vpack.c.bf16 %v3065_v28, %v3064_v27  ;;  %v3067_v31 = vld [vmem:[%s5223_s5 + $0x68] sm:$0xff]  ;;  %s4190_s5 = scalar_lea.vmem %s3155_s26, 32 }
 0x13c   :  { %v2554_v37 = vadd.f32 %v3549_v34, %v2514_v33  ;;  %v3920_v34 = vpack.c.bf16 %v3067_v31, %v3066_v30  ;;  %p4191_p0 = scmp.ne.s32.totalorder %s3155_s26, %s4190_s5  ;;  %p4196_p2 = scmp.lt.s32.totalorder %s4190_s5, %s4190_s5 }
 0x13d   :  { %3915 = vmatpush3.bf16.msra.mxu1 %v3914_v26  ;;  %v3420_v26 = vld [vmem:[%s5224_s6] ss:$0 sm:$0xff] }
 0x13e   :  { %3916 = vmatprep.subr.bf16.mxu1 %v4215_v42  ;;  %p4197_p3 = por %p4196_p2, %p4195_p1 }
 0x140   :  { %p4198_p4 = pnand %p4197_p3, %p4191_p0 }
 0x141   :  { %3918 = vmatpush3.bf16.msra.mxu1 %v3917_v29 }
 0x142   :  { %3919 = vmatprep.subr.bf16.mxu1 %v4215_v42 }
 0x145   :  { %3921 = vmatpush3.bf16.msra.mxu1 %v3920_v34 }
 0x146   :  { %3922 = vmatprep.subr.bf16.mxu1 %v4215_v42 }
 0x149   :  { %3924 = vmatpush3.bf16.msra.mxu1 %v3923_v22 }
 0x156   :  { %v3569_v58 = vpop.f32.mrb[12].mxu0 }
 0x157   :  { %v3570_v59 = vpop.f32.mrb[13].mxu0 }
 0x158   :  { %v3591_v60 = vpop.f32.mrb[12].mxu1  ;;  %v3571_v61 = vadd.f32 %v3570_v59, %v3569_v58  ;;  %v3572_v62 = vpop.f32.mrb[14].mxu0 }
 0x159   :  { %v3592_v1 = vpop.f32.mrb[13].mxu1  ;;  %v3573_v2 = vpop.f32.mrb[15].mxu0 }
 0x15a   :  { %v2594_v4 = vadd.f32 %v3571_v61, %v2554_v37  ;;  %v3593_v5 = vadd.f32 %v3592_v1, %v3591_v60  ;;  %v3594_v6 = vpop.f32.mrb[14].mxu1 }
 0x15b   :  { %v3595_v7 = vpop.f32.mrb[15].mxu1 }
 0x15c   :  { %v2634_v8 = vadd.f32 %v3593_v5, %v2594_v4 }
 0x176   :  { %v3613_v32 = vpop.f32.mrb[16].mxu0 }
 0x177   :  { %v3614_v33 = vpop.f32.mrb[17].mxu0 }
 0x178   :  { %v3635_v35 = vpop.f32.mrb[16].mxu1  ;;  %v3615_v36 = vadd.f32 %v3614_v33, %v3613_v32  ;;  %v3616_v37 = vpop.f32.mrb[18].mxu0 }
 0x179   :  { %v3636_v38 = vpop.f32.mrb[17].mxu1  ;;  %v3617_v39 = vpop.f32.mrb[19].mxu0 }
 0x17a   :  { %v2674_v40 = vadd.f32 %v3615_v36, %v2634_v8  ;;  %v3637_v43 = vadd.f32 %v3636_v38, %v3635_v35  ;;  %v3638_v44 = vpop.f32.mrb[18].mxu1 }
 0x17b   :  { %v3639_v45 = vpop.f32.mrb[19].mxu1 }
 0x17c   :  { %v2714_v46 = vadd.f32 %v3637_v43, %v2674_v40 }
 0x196   :  { %v3657_v47 = vpop.f32.mrb[20].mxu0 }
 0x197   :  { %v3658_v48 = vpop.f32.mrb[21].mxu0 }
 0x198   :  { %v3679_v49 = vpop.f32.mrb[20].mxu1  ;;  %v3659_v50 = vadd.f32 %v3658_v48, %v3657_v47  ;;  %v3660_v51 = vpop.f32.mrb[22].mxu0 }
 0x199   :  { %v3680_v52 = vpop.f32.mrb[21].mxu1  ;;  %v3661_v53 = vpop.f32.mrb[23].mxu0 }
 0x19a   :  { %v2754_v54 = vadd.f32 %v3659_v50, %v2714_v46  ;;  %v3681_v55 = vadd.f32 %v3680_v52, %v3679_v49  ;;  %v3682_v56 = vpop.f32.mrb[22].mxu1 }
 0x19b   :  { %v3683_v57 = vpop.f32.mrb[23].mxu1 }
 0x19c   :  { %v2794_v58 = vadd.f32 %v3681_v55, %v2754_v54 }
 0x1b6   :  { %v3701_v59 = vpop.f32.mrb[24].mxu0 }
 0x1b7   :  { %v3702_v60 = vpop.f32.mrb[25].mxu0 }
 0x1b8   :  { %v3723_v61 = vpop.f32.mrb[24].mxu1  ;;  %v3703_v62 = vadd.f32 %v3702_v60, %v3701_v59  ;;  %v3704_v63 = vpop.f32.mrb[26].mxu0 }
 0x1b9   :  { %v3724_v0 = vpop.f32.mrb[25].mxu1  ;;  %v3705_v1 = vpop.f32.mrb[27].mxu0 }
 0x1ba   :  { %v2834_v42 = vadd.f32 %v3703_v62, %v2794_v58  ;;  %v3725_v2 = vadd.f32 %v3724_v0, %v3723_v61  ;;  %v3726_v3 = vpop.f32.mrb[26].mxu1 }
 0x1bb   :  { %v3727_v4 = vpop.f32.mrb[27].mxu1 }
 0x1bc   :  { %v2874_v5 = vadd.f32 %v3725_v2, %v2834_v42 }
 0x1d6   :  { %v3745_v6 = vpop.f32.mrb[28].mxu0 }
 0x1d7   :  { %v3746_v7 = vpop.f32.mrb[29].mxu0 }
 0x1d8   :  { %v3767_v8 = vpop.f32.mrb[28].mxu1  ;;  %v3747_v9 = vadd.f32 %v3746_v7, %v3745_v6  ;;  %v3748_v10 = vpop.f32.mrb[30].mxu0 }
 0x1d9   :  { %v3768_v11 = vpop.f32.mrb[29].mxu1  ;;  %v3749_v12 = vpop.f32.mrb[31].mxu0 }
 0x1da   :  { %v2914_v13 = vadd.f32 %v3747_v9, %v2874_v5  ;;  %v3769_v14 = vadd.f32 %v3768_v11, %v3767_v8  ;;  %v3770_v15 = vpop.f32.mrb[30].mxu1 }
 0x1db   :  { %v3771_v16 = vpop.f32.mrb[31].mxu1 }
 0x1dc   :  { %v2954_v17 = vadd.f32 %v3769_v14, %v2914_v13 }
 0x1de   :  { %v2959_v18 = vmax.f32 %v2954_v17, 0.0 }
 0x1e0   :  { %3840 = vmatmul.mubr.f32.vlgmr.msra.gmra.mrb[32].mxu0 %v2959_v18 }
 0x2b3   :  { %v3049_v41 = vpop.f32.mrb[32].mxu0 }
 0x2b4   :  { %v3050_v19 = vadd.f32 %v3419_v23, %v3049_v41  ;;  %v3841_v24 = vpop.f32.mrb[33].mxu0 }
 0x2b6   :  { %v3053_v25 = vmax.f32 %v3050_v19, 0.0 }
 0x2b8   :  { %3875 = vmatmul.mubr.f32.vlgmr.msra.gmra.mrb[32].mxu1 %v3053_v25 }
 0x38b   :  { %v3143_v27 = vpop.f32.mrb[32].mxu1 }
 0x38c   :  { %v3144_v28 = vadd.f32 %v3420_v26, %v3143_v27  ;;  %v3876_v29 = vpop.f32.mrb[33].mxu1 }
 0x38e   :  { %3147 = vst [vmem:[#allocation2] sm:$0x3] %v3144_v28 }
 0x38f   :  { %4201 = shalt.err (!%p4198_p4)
}
 0x390   :  { %s4202_s28 = scalar_lea.hbm %s5225_s7, 32 }
 0x391   :  { %p4203_p5 = scmp.ne.s32.totalorder %s5225_s7, %s4202_s28  ;;  %p4206_p6 = scmp.lt.u32.totalorder %s4202_s28, %s5225_s7 }
 0x393   :  { %p4208_p7 = pnand %p4206_p6, %p4203_p5 }
 0x395   :  { %4211 = shalt.err (!%p4208_p7)
}
 0x396   :  { %3157 = dma.vmem_to_hbm [thread:$0]  %s3155_s26, 32, %s5225_s7, [#allocation3]  }
 0x397   :  { %4212 = dma.done.wait [#allocation3], 32  }
 0x398   :  { %4213 = vsyncadd [#allocation3], 4294967264 }
 0x399   :  { %3161 = vsyncpa [#allocation3], 1 }

</bundles_post_ra>
